<compile_context>
chip_gen: v7x
topology: tpu7x:2x2x1
jax: 0.10.0
libtpu: 0.0.40
codegen_flags: <defaults>
</compile_context>

<pallas_src>
import math
import functools

import jax
import jax.numpy as jnp
from jax import lax
from jax.experimental import pallas as pl
from jax.experimental.pallas import tpu as pltpu


def _cross_attn_kernel(hidden_ref, context_ref,
                       wq_ref, bq_ref, wkv_ref, bkv_ref,
                       wd_ref, bd_ref, gamma_ref, beta_ref,
                       out_ref,
                       kv_scr, q_scr, ctx_scr,
                       *, num_heads, head_size, hidden_size, compute_dtype):
    """One (direction, batch, q-tile) step: cross-attention(hidden <- context) + BertOutput."""
    f32 = jnp.float32
    qt = pl.program_id(2)

    # --- fused K/V projection, recomputed only when (direction, batch) changes -------------
    # INVARIANT: this cache is only valid because the q-tile axis is the *innermost* grid
    # axis and is marked "arbitrary": all q-tiles of a given (d, b) run back-to-back on one
    # core with qt == 0 first.  Do not reorder the grid or mark axis 2 as "parallel".
    @pl.when(qt == 0)
    def _():
        kv = jnp.dot(context_ref[...], wkv_ref[...], preferred_element_type=f32)
        kv_scr[...] = (kv + bkv_ref[...]).astype(compute_dtype)          # (Sc, 2H)

    # --- Q projection (1/sqrt(dh) folded into Wq/bq by the wrapper) -------------------------
    # Spill Q to VMEM and read per-head slices from the ref below, so neither Q nor the
    # hidden tile has to stay live in vregs across the head loop.
    q = jnp.dot(hidden_ref[...], wq_ref[...], preferred_element_type=f32) + bq_ref[...]
    q_scr[...] = q.astype(compute_dtype)                                 # (tq, H)

    # --- per-head attention ------------------------------------------------------------------
    # Static loop / static lane slices (guaranteed lowering for any head_size, incl. dh<128).
    # All operands come from VMEM refs, so only one head's (tq, Sc) f32 intermediates are
    # live per iteration.
    for hd in range(num_heads):
        sl = slice(hd * head_size, (hd + 1) * head_size)
        vsl = slice(hidden_size + hd * head_size,
                    hidden_size + (hd + 1) * head_size)
        qh = q_scr[:, sl]                                                # (tq, dh) bf16
        kh = kv_scr[:, sl]                                               # (Sc, dh) bf16
        # scores = qh @ kh^T without materializing a transpose
        s = lax.dot_general(qh, kh, (((1,), (1,)), ((), ())),
                            preferred_element_type=f32)                  # (tq, Sc) f32
        s = s - jnp.max(s, axis=-1, keepdims=True)
        # f32 exp: safe on v5e (no bf16 EUP).  On v6e/v7x, if profiling shows the EUP is
        # the binding unit, p = jnp.exp(s.astype(bf16)) is a further (validated) option.
        p = jnp.exp(s)
        l = jnp.sum(p, axis=-1, keepdims=True)                           # (tq, 1) f32
        # TODO(synk): attention_probs dropout omitted (inference / p = 0 behavior).
        ctx_h = jnp.dot(p.astype(compute_dtype), kv_scr[:, vsl],
                        preferred_element_type=f32)                      # (tq, dh) f32
        ctx_h = ctx_h * pl.reciprocal(l, approx=True)                    # deferred softmax norm (EUP)
        ctx_scr[:, sl] = ctx_h.astype(compute_dtype)                     # write head slice

    # --- BertOutput: dense -> (dropout: identity) -> LayerNorm(dense + residual) -------------
    # TODO(synk): hidden_dropout omitted (inference / p = 0 behavior).
    dense = (jnp.dot(ctx_scr[...], wd_ref[...], preferred_element_type=f32)
             + bd_ref[...])                                              # (tq, H) f32
    resid = dense + hidden_ref[...].astype(f32)   # residual input re-read here, not kept live
    mu = jnp.mean(resid, axis=-1, keepdims=True)
    var = jnp.mean((resid - mu) ** 2, axis=-1, keepdims=True)
    normed = (resid - mu) * lax.rsqrt(var + 1e-12)
    out_ref[...] = (normed * gamma_ref[...] + beta_ref[...]).astype(out_ref.dtype)


def _pick_tq(sh, sc):
    """Shape-aware q-tile: tq=128 for long contexts (f32 (tq,Sc) scores), else 256.
    Returns (tq, padded_sh); Sh is zero-padded to a multiple of tq so an odd Sh never
    degenerates into tq = Sh."""
    if sh <= 128:
        return sh, sh
    tq = 128 if sc > 1024 else 256
    if sh <= tq:
        return sh, sh
    sh_pad = ((sh + tq - 1) // tq) * tq
    return tq, sh_pad


def _vmem_limit_bytes():
    """Derive the scoped-VMEM limit from the actual part (v7x has 64 MiB, v5e/v6e 128 MiB)."""
    cap = 128 * 1024 * 1024
    try:
        cap = int(pltpu.get_tpu_info().vmem_capacity_bytes)
    except Exception:
        pass
    return int(min(cap // 2, 48 * 1024 * 1024))


def _stack_params(plist, num_heads, H, compute_dtype):
    """Stack per-direction params; fold attention scale into Wq/bq; fuse K|V; cast weights bf16."""
    scale = 1.0 / math.sqrt(H // num_heads)

    def stack(fn):
        return jnp.stack([fn(p) for p in plist])

    return {
        "wq":  stack(lambda p: (p["wq"] * scale).astype(compute_dtype)),                       # (D,H,H)
        "bq":  stack(lambda p: (p["bq"] * scale).astype(jnp.float32)),                         # (D,1,H)
        "wkv": stack(lambda p: jnp.concatenate([p["wk"], p["wv"]], 1).astype(compute_dtype)),  # (D,H,2H)
        "bkv": stack(lambda p: jnp.concatenate([p["bk"], p["bv"]], 1).astype(jnp.float32)),    # (D,1,2H)
        "wd":  stack(lambda p: p["wd"].astype(compute_dtype)),                                 # (D,H,H)
        "bd":  stack(lambda p: p["bd"].astype(jnp.float32)),                                   # (D,1,H)
        "gamma": stack(lambda p: p["gamma"].astype(jnp.float32)),                              # (D,1,H)
        "beta":  stack(lambda p: p["beta"].astype(jnp.float32)),                               # (D,1,H)
    }


def _cross_attn_pallas(hidden_all, context_all, sp, *, num_heads,
                       compute_dtype=jnp.bfloat16):
    """hidden_all/context_all: (D, B, S, H).  Returns (D, B, Sh, H) in hidden_all.dtype."""
    D, B, Sh, H = hidden_all.shape
    Sc = context_all.shape[2]
    assert H % num_heads == 0, "hidden_size must be divisible by num_heads"
    dh = H // num_heads
    tq, sh_pad = _pick_tq(Sh, Sc)
    if sh_pad != Sh:
        hidden_all = jnp.pad(hidden_all, ((0, 0), (0, 0), (0, sh_pad - Sh), (0, 0)))
    n_qt = sh_pad // tq

    h_in = hidden_all.astype(compute_dtype)
    c_in = context_all.astype(compute_dtype)

    kernel = functools.partial(_cross_attn_kernel,
                               num_heads=num_heads, head_size=dh,
                               hidden_size=H, compute_dtype=compute_dtype)

    data_map = lambda d, b, t: (d, b, t, 0)
    ctx_map = lambda d, b, t: (d, b, 0, 0)
    w_map = lambda d, b, t: (d, 0, 0)

    args = (h_in, c_in, sp["wq"], sp["bq"], sp["wkv"], sp["bkv"],
            sp["wd"], sp["bd"], sp["gamma"], sp["beta"])

    itemsize = jnp.dtype(hidden_all.dtype).itemsize
    flops = int(D * B * (4 * sh_pad * H * H        # Q proj + output dense
                         + 4 * Sc * H * H          # fused K/V proj
                         + 4 * sh_pad * Sc * H))   # scores + probs@V over all heads
    transcendentals = int(D * B * num_heads * sh_pad * Sc)
    bytes_accessed = int(sum(int(a.size) * a.dtype.itemsize for a in args)
                         + D * B * sh_pad * H * itemsize)

    def _run(single_buffer_weights):
        if single_buffer_weights:
            # Weights/biases only change when the direction index flips (twice per call):
            # single-buffer them so v7x's 64 MiB VMEM is not wasted on useless overlap.
            w_spec = lambda shp: pl.BlockSpec(shp, w_map, pipeline_mode=pl.Buffered(1))
        else:
            w_spec = lambda shp: pl.BlockSpec(shp, w_map)

        in_specs = [
            pl.BlockSpec((None, None, tq, H), data_map),   # hidden q-tile
            pl.BlockSpec((None, None, Sc, H), ctx_map),    # full context
            w_spec((None, H, H)),        # Wq (scaled, bf16)
            w_spec((None, 1, H)),        # bq (scaled, f32)
            w_spec((None, H, 2 * H)),    # W_kv (bf16)
            w_spec((None, 1, 2 * H)),    # b_kv (f32)
            w_spec((None, H, H)),        # Wd (bf16)
            w_spec((None, 1, H)),        # bd (f32)
            w_spec((None, 1, H)),        # gamma
            w_spec((None, 1, H)),        # beta
        ]
        out_spec = pl.BlockSpec((None, None, tq, H), data_map)

        return pl.pallas_call(
            kernel,
            out_shape=jax.ShapeDtypeStruct((D, B, sh_pad, H), hidden_all.dtype),
            grid_spec=pltpu.PrefetchScalarGridSpec(
                num_scalar_prefetch=0,
                grid=(D, B, n_qt),
                in_specs=in_specs,
                out_specs=out_spec,
                scratch_shapes=[
                    pltpu.VMEM((Sc, 2 * H), compute_dtype),   # cached K|V projection
                    pltpu.VMEM((tq, H), compute_dtype),       # Q for current tile
                    pltpu.VMEM((tq, H), compute_dtype),       # per-head context assembly
                ],
            ),
            compiler_params=pltpu.CompilerParams(
                dimension_semantics=("parallel", "parallel", "arbitrary"),
                vmem_limit_bytes=_vmem_limit_bytes(),
            ),
            cost_estimate=pl.CostEstimate(flops=flops,
                                          transcendentals=transcendentals,
                                          bytes_accessed=bytes_accessed),
        )(*args)

    try:
        out = _run(True)
    except Exception:
        # pipeline_mode / pl.Buffered(1) unsupported on this jax build -> default buffering.
        out = _run(False)

    if sh_pad != Sh:
        out = out[:, :, :Sh, :]
    return out


def cross_attention_layer_bert(x, y, params_x, params_y, *, num_heads,
                               compute_dtype=jnp.bfloat16):
    """Mirrors CrossAttentionLayerBert.forward: returns (out_x, out_y).

    params_*: dict with wq,bq,wk,bk,wv,bv,wd,bd,gamma,beta.  Weights are (H, H),
    pre-transposed to (in, out); biases/gamma/beta are (1, H).
    """
    H = x.shape[-1]
    if x.shape == y.shape and x.dtype == y.dtype:
        # Merge both directions into one pallas_call: grid leading axes (2, B) are
        # parallel -> both v7x TensorCores get work; weight DMA overlaps compute.
        hidden_all = jnp.stack([x, y])     # (2, B, S, H)
        context_all = jnp.stack([y, x])    # (2, B, S, H)
        sp = _stack_params([params_x, params_y], num_heads, H, compute_dtype)
        out = _cross_attn_pallas(hidden_all, context_all, sp,
                                 num_heads=num_heads, compute_dtype=compute_dtype)
        return out[0], out[1]
    # Fallback when sequence lengths differ: two calls (D = 1 each).
    spx = _stack_params([params_x], num_heads, H, compute_dtype)
    spy = _stack_params([params_y], num_heads, H, compute_dtype)
    out_x = _cross_attn_pallas(x[None], y[None], spx,
                               num_heads=num_heads, compute_dtype=compute_dtype)[0]
    out_y = _cross_attn_pallas(y[None], x[None], spy,
                               num_heads=num_heads, compute_dtype=compute_dtype)[0]
    return out_x, out_y


# ---------------------------------------------------------------------------
# pure-JAX reference (f32 math, bf16-rounded inputs/weights to match kernel storage)
# ---------------------------------------------------------------------------
def _ref_block(hidden, context, p, num_heads, compute_dtype=jnp.bfloat16):
    f32 = jnp.float32
    B, Sh, H = hidden.shape
    Sc = context.shape[1]
    dh = H // num_heads
    h = hidden.astype(compute_dtype).astype(f32)
    c = context.astype(compute_dtype).astype(f32)

    def w(name):
        return p[name].astype(compute_dtype).astype(f32)

    q = h @ w("wq") + p["bq"]
    k = c @ w("wk") + p["bk"]
    v = c @ w("wv") + p["bv"]

    def split(t, S):
        return t.reshape(B, S, num_heads, dh).transpose(0, 2, 1, 3)

    qh, kh, vh = split(q, Sh), split(k, Sc), split(v, Sc)
    scores = jnp.einsum("bhqd,bhkd->bhqk", qh, kh) / math.sqrt(dh)
    probs = jax.nn.softmax(scores, axis=-1)
    ctx = jnp.einsum("bhqk,bhkd->bhqd", probs, vh)
    ctx = ctx.transpose(0, 2, 1, 3).reshape(B, Sh, H)
    dense = ctx @ w("wd") + p["bd"]
    resid = dense + h
    mu = resid.mean(-1, keepdims=True)
    var = ((resid - mu) ** 2).mean(-1, keepdims=True)
    return (resid - mu) * jax.lax.rsqrt(var + 1e-12) * p["gamma"] + p["beta"]


def _init_params(key, H):
    keys = jax.random.split(key, 10)
    s = 1.0 / math.sqrt(H)

    def mat(k):
        return jax.random.normal(k, (H, H), jnp.float32) * s

    def vec(k):
        return jax.random.normal(k, (1, H), jnp.float32) * s

    return {
        "wq": mat(keys[0]), "bq": vec(keys[1]),
        "wk": mat(keys[2]), "bk": vec(keys[3]),
        "wv": mat(keys[4]), "bv": vec(keys[5]),
        "wd": mat(keys[6]), "bd": vec(keys[7]),
        "gamma": jnp.ones((1, H), jnp.float32),
        "beta": jnp.zeros((1, H), jnp.float32),
    }


if __name__ == "__main__":
    B, Sx, Sy, H, NUM_HEADS = 2, 8, 8, 32, 4

    key = jax.random.PRNGKey(0)
    kx, ky, kpx, kpy = jax.random.split(key, 4)
    x = jax.random.normal(kx, (B, Sx, H), jnp.float32)
    y = jax.random.normal(ky, (B, Sy, H), jnp.float32)
    params_x = _init_params(kpx, H)
    params_y = _init_params(kpy, H)

    out_x, out_y = cross_attention_layer_bert(x, y, params_x, params_y,
                                              num_heads=NUM_HEADS)
    jax.block_until_ready((out_x, out_y))

    ref_x = _ref_block(x, y, params_x, NUM_HEADS)
    ref_y = _ref_block(y, x, params_y, NUM_HEADS)
    # bf16 MXU inputs -> loosened tolerance vs f32 reference.
    err_x = float(jnp.max(jnp.abs(out_x - ref_x)))
    err_y = float(jnp.max(jnp.abs(out_y - ref_y)))
    assert jnp.allclose(out_x, ref_x, atol=5e-2, rtol=5e-2), err_x
    assert jnp.allclose(out_y, ref_y, atol=5e-2, rtol=5e-2), err_y

    print("KERNEL_OK")
</pallas_src>

<mosaic_0001>
module attributes {stable_mosaic.version = 11 : i64} {
  func.func @_cross_attn_kernel(%arg0: i32, %arg1: i32, %arg2: i32, %arg3: memref<1x1x8x32xbf16, #tpu.memory_space<vmem>>, %arg4: memref<1x1x8x32xbf16, #tpu.memory_space<vmem>>, %arg5: memref<1x32x32xbf16, #tpu.memory_space<vmem>>, %arg6: memref<1x1x32xf32, #tpu.memory_space<vmem>>, %arg7: memref<1x32x64xbf16, #tpu.memory_space<vmem>>, %arg8: memref<1x1x64xf32, #tpu.memory_space<vmem>>, %arg9: memref<1x32x32xbf16, #tpu.memory_space<vmem>>, %arg10: memref<1x1x32xf32, #tpu.memory_space<vmem>>, %arg11: memref<1x1x32xf32, #tpu.memory_space<vmem>>, %arg12: memref<1x1x32xf32, #tpu.memory_space<vmem>>, %arg13: memref<1x1x8x32xf32, #tpu.memory_space<vmem>>, %arg14: memref<8x64xbf16, #tpu.memory_space<vmem>>, %arg15: memref<8x32xbf16, #tpu.memory_space<vmem>>, %arg16: memref<8x32xbf16, #tpu.memory_space<vmem>>) attributes {dimension_semantics = [#tpu.dimension_semantics<parallel>, #tpu.dimension_semantics<parallel>, #tpu.dimension_semantics<arbitrary>], iteration_bounds = array<i64: 2, 2, 1>, scalar_prefetch = 0 : i64, scratch_operands = 3 : i64, tpu.core_type = #tpu.core_type<tc>, window_params = [{transform_indices = @transform_0, window_bounds = array<i64: 1, 1, 8, 32>}, {transform_indices = @transform_1, window_bounds = array<i64: 1, 1, 8, 32>}, {pipeline_mode = #tpu.pipeline_mode<synchronous>, transform_indices = @transform_2, window_bounds = array<i64: 1, 32, 32>}, {pipeline_mode = #tpu.pipeline_mode<synchronous>, transform_indices = @transform_3, window_bounds = array<i64: 1, 1, 32>}, {pipeline_mode = #tpu.pipeline_mode<synchronous>, transform_indices = @transform_4, window_bounds = array<i64: 1, 32, 64>}, {pipeline_mode = #tpu.pipeline_mode<synchronous>, transform_indices = @transform_5, window_bounds = array<i64: 1, 1, 64>}, {pipeline_mode = #tpu.pipeline_mode<synchronous>, transform_indices = @transform_6, window_bounds = array<i64: 1, 32, 32>}, {pipeline_mode = #tpu.pipeline_mode<synchronous>, transform_indices = @transform_7, window_bounds = array<i64: 1, 1, 32>}, {pipeline_mode = #tpu.pipeline_mode<synchronous>, transform_indices = @transform_8, window_bounds = array<i64: 1, 1, 32>}, {pipeline_mode = #tpu.pipeline_mode<synchronous>, transform_indices = @transform_9, window_bounds = array<i64: 1, 1, 32>}, {transform_indices = @transform_10, window_bounds = array<i64: 1, 1, 8, 32>}]} {
    %c0_i32 = arith.constant 0 : i32
    %0 = arith.cmpi eq, %arg2, %c0_i32 : i32
    %1 = arith.extui %0 : i1 to i32
    %c0_i32_0 = arith.constant 0 : i32
    %2 = arith.cmpi ne, %1, %c0_i32_0 : i32
    scf.if %2 {
      %c0_81 = arith.constant 0 : index
      %c0_82 = arith.constant 0 : index
      %c0_83 = arith.constant 0 : index
      %c0_84 = arith.constant 0 : index
      %127 = vector.load %arg4[%c0_81, %c0_82, %c0_83, %c0_84] : memref<1x1x8x32xbf16, #tpu.memory_space<vmem>>, vector<1x1x8x32xbf16>
      %128 = vector.shape_cast %127 : vector<1x1x8x32xbf16> to vector<8x32xbf16>
      %c0_85 = arith.constant 0 : index
      %c0_86 = arith.constant 0 : index
      %c0_87 = arith.constant 0 : index
      %129 = vector.load %arg7[%c0_85, %c0_86, %c0_87] : memref<1x32x64xbf16, #tpu.memory_space<vmem>>, vector<1x32x64xbf16>
      %130 = vector.shape_cast %129 : vector<1x32x64xbf16> to vector<32x64xbf16>
      %cst_88 = arith.constant dense<0.000000e+00> : vector<8x64xf32>
      %131 = tpu.matmul %128, %130, %cst_88 {dimension_numbers = #tpu.dot_dimension_numbers<[1], [0], [0], [1], [0, 0, 1, 1], [], []>} : vector<8x32xbf16>, vector<32x64xbf16>, vector<8x64xf32> -> vector<8x64xf32>
      %c0_89 = arith.constant 0 : index
      %c0_90 = arith.constant 0 : index
      %c0_91 = arith.constant 0 : index
      %132 = vector.load %arg8[%c0_89, %c0_90, %c0_91] : memref<1x1x64xf32, #tpu.memory_space<vmem>>, vector<1x1x64xf32>
      %133 = vector.shape_cast %132 : vector<1x1x64xf32> to vector<1x64xf32>
      %134 = vector.broadcast %133 : vector<1x64xf32> to vector<8x64xf32>
      %135 = arith.addf %131, %134 : vector<8x64xf32>
      %136 = arith.truncf %135 : vector<8x64xf32> to vector<8x64xbf16>
      %c0_92 = arith.constant 0 : index
      %c0_93 = arith.constant 0 : index
      %137 = vector.load %arg14[%c0_92, %c0_93] : memref<8x64xbf16, #tpu.memory_space<vmem>>, vector<8x64xbf16>
      tpu.vector_store %arg14[%c0_92, %c0_93], %136 {strides = array<i32>} : memref<8x64xbf16, #tpu.memory_space<vmem>>, vector<8x64xbf16>,
    } else {
    }
    %c0 = arith.constant 0 : index
    %c0_1 = arith.constant 0 : index
    %c0_2 = arith.constant 0 : index
    %c0_3 = arith.constant 0 : index
    %3 = vector.load %arg3[%c0, %c0_1, %c0_2, %c0_3] : memref<1x1x8x32xbf16, #tpu.memory_space<vmem>>, vector<1x1x8x32xbf16>
    %4 = vector.shape_cast %3 : vector<1x1x8x32xbf16> to vector<8x32xbf16>
    %c0_4 = arith.constant 0 : index
    %c0_5 = arith.constant 0 : index
    %c0_6 = arith.constant 0 : index
    %5 = vector.load %arg5[%c0_4, %c0_5, %c0_6] : memref<1x32x32xbf16, #tpu.memory_space<vmem>>, vector<1x32x32xbf16>
    %6 = vector.shape_cast %5 : vector<1x32x32xbf16> to vector<32x32xbf16>
    %cst = arith.constant dense<0.000000e+00> : vector<8x32xf32>
    %7 = tpu.matmul %4, %6, %cst {dimension_numbers = #tpu.dot_dimension_numbers<[1], [0], [0], [1], [0, 0, 1, 1], [], []>} : vector<8x32xbf16>, vector<32x32xbf16>, vector<8x32xf32> -> vector<8x32xf32>
    %c0_7 = arith.constant 0 : index
    %c0_8 = arith.constant 0 : index
    %c0_9 = arith.constant 0 : index
    %8 = vector.load %arg6[%c0_7, %c0_8, %c0_9] : memref<1x1x32xf32, #tpu.memory_space<vmem>>, vector<1x1x32xf32>
    %9 = vector.shape_cast %8 : vector<1x1x32xf32> to vector<1x32xf32>
    %10 = vector.broadcast %9 : vector<1x32xf32> to vector<8x32xf32>
    %11 = arith.addf %7, %10 : vector<8x32xf32>
    %12 = arith.truncf %11 : vector<8x32xf32> to vector<8x32xbf16>
    %c0_10 = arith.constant 0 : index
    %c0_11 = arith.constant 0 : index
    %13 = vector.load %arg15[%c0_10, %c0_11] : memref<8x32xbf16, #tpu.memory_space<vmem>>, vector<8x32xbf16>
    tpu.vector_store %arg15[%c0_10, %c0_11], %12 {strides = array<i32>} : memref<8x32xbf16, #tpu.memory_space<vmem>>, vector<8x32xbf16>,
    %c0_12 = arith.constant 0 : index
    %c0_13 = arith.constant 0 : index
    %14 = vector.load %arg15[%c0_12, %c0_13] : memref<8x32xbf16, #tpu.memory_space<vmem>>, vector<8x8xbf16>
    %c0_14 = arith.constant 0 : index
    %c0_15 = arith.constant 0 : index
    %15 = vector.load %arg14[%c0_14, %c0_15] : memref<8x64xbf16, #tpu.memory_space<vmem>>, vector<8x8xbf16>
    %cst_16 = arith.constant dense<0.000000e+00> : vector<8x8xf32>
    %16 = tpu.matmul %14, %15, %cst_16 {dimension_numbers = #tpu.dot_dimension_numbers<[1], [1], [0], [0], [0, 0, 1, 0], [], []>} : vector<8x8xbf16>, vector<8x8xbf16>, vector<8x8xf32> -> vector<8x8xf32>
    %cst_17 = arith.constant dense<0xFF800000> : vector<8xf32>
    %17 = vector.multi_reduction <maximumf>, %16, %cst_17 [1] : vector<8x8xf32> to vector<8xf32>
    %18 = vector.shape_cast %17 : vector<8xf32> to vector<8x1xf32>
    %19 = vector.broadcast %18 : vector<8x1xf32> to vector<8x8xf32>
    %20 = arith.subf %16, %19 : vector<8x8xf32>
    %21 = math.exp %20 : vector<8x8xf32>
    %cst_18 = arith.constant dense<0.000000e+00> : vector<8xf32>
    %22 = vector.multi_reduction <add>, %21, %cst_18 [1] : vector<8x8xf32> to vector<8xf32>
    %23 = vector.shape_cast %22 : vector<8xf32> to vector<8x1xf32>
    %24 = arith.truncf %21 : vector<8x8xf32> to vector<8x8xbf16>
    %c0_19 = arith.constant 0 : index
    %c32 = arith.constant 32 : index
    %25 = vector.load %arg14[%c0_19, %c32] : memref<8x64xbf16, #tpu.memory_space<vmem>>, vector<8x8xbf16>
    %cst_20 = arith.constant dense<0.000000e+00> : vector<8x8xf32>
    %26 = tpu.matmul %24, %25, %cst_20 {dimension_numbers = #tpu.dot_dimension_numbers<[1], [0], [0], [1], [0, 0, 1, 1], [], []>} : vector<8x8xbf16>, vector<8x8xbf16>, vector<8x8xf32> -> vector<8x8xf32>
    %27 = tpu.reciprocal %23 {approx = true} : vector<8x1xf32> -> vector<8x1xf32>
    %28 = vector.broadcast %27 : vector<8x1xf32> to vector<8x8xf32>
    %29 = arith.mulf %26, %28 : vector<8x8xf32>
    %30 = arith.truncf %29 : vector<8x8xf32> to vector<8x8xbf16>
    %c0_21 = arith.constant 0 : index
    %c0_22 = arith.constant 0 : index
    %31 = vector.load %arg16[%c0_21, %c0_22] : memref<8x32xbf16, #tpu.memory_space<vmem>>, vector<8x8xbf16>
    tpu.vector_store %arg16[%c0_21, %c0_22], %30 {strides = array<i32>} : memref<8x32xbf16, #tpu.memory_space<vmem>>, vector<8x8xbf16>,
    %c0_23 = arith.constant 0 : index
    %c8 = arith.constant 8 : index
    %32 = vector.load %arg15[%c0_23, %c8] : memref<8x32xbf16, #tpu.memory_space<vmem>>, vector<8x8xbf16>
    %c0_24 = arith.constant 0 : index
    %c8_25 = arith.constant 8 : index
    %33 = vector.load %arg14[%c0_24, %c8_25] : memref<8x64xbf16, #tpu.memory_space<vmem>>, vector<8x8xbf16>
    %cst_26 = arith.constant dense<0.000000e+00> : vector<8x8xf32>
    %34 = tpu.matmul %32, %33, %cst_26 {dimension_numbers = #tpu.dot_dimension_numbers<[1], [1], [0], [0], [0, 0, 1, 0], [], []>} : vector<8x8xbf16>, vector<8x8xbf16>, vector<8x8xf32> -> vector<8x8xf32>
    %cst_27 = arith.constant dense<0xFF800000> : vector<8xf32>
    %35 = vector.multi_reduction <maximumf>, %34, %cst_27 [1] : vector<8x8xf32> to vector<8xf32>
    %36 = vector.shape_cast %35 : vector<8xf32> to vector<8x1xf32>
    %37 = vector.broadcast %36 : vector<8x1xf32> to vector<8x8xf32>
    %38 = arith.subf %34, %37 : vector<8x8xf32>
    %39 = math.exp %38 : vector<8x8xf32>
    %cst_28 = arith.constant dense<0.000000e+00> : vector<8xf32>
    %40 = vector.multi_reduction <add>, %39, %cst_28 [1] : vector<8x8xf32> to vector<8xf32>
    %41 = vector.shape_cast %40 : vector<8xf32> to vector<8x1xf32>
    %42 = arith.truncf %39 : vector<8x8xf32> to vector<8x8xbf16>
    %c0_29 = arith.constant 0 : index
    %c40 = arith.constant 40 : index
    %43 = vector.load %arg14[%c0_29, %c40] : memref<8x64xbf16, #tpu.memory_space<vmem>>, vector<8x8xbf16>
    %cst_30 = arith.constant dense<0.000000e+00> : vector<8x8xf32>
    %44 = tpu.matmul %42, %43, %cst_30 {dimension_numbers = #tpu.dot_dimension_numbers<[1], [0], [0], [1], [0, 0, 1, 1], [], []>} : vector<8x8xbf16>, vector<8x8xbf16>, vector<8x8xf32> -> vector<8x8xf32>
    %45 = tpu.reciprocal %41 {approx = true} : vector<8x1xf32> -> vector<8x1xf32>
    %46 = vector.broadcast %45 : vector<8x1xf32> to vector<8x8xf32>
    %47 = arith.mulf %44, %46 : vector<8x8xf32>
    %48 = arith.truncf %47 : vector<8x8xf32> to vector<8x8xbf16>
    %c0_31 = arith.constant 0 : index
    %c8_32 = arith.constant 8 : index
    %49 = vector.load %arg16[%c0_31, %c8_32] : memref<8x32xbf16, #tpu.memory_space<vmem>>, vector<8x8xbf16>
    tpu.vector_store %arg16[%c0_31, %c8_32], %48 {strides = array<i32>} : memref<8x32xbf16, #tpu.memory_space<vmem>>, vector<8x8xbf16>,
    %c0_33 = arith.constant 0 : index
    %c16 = arith.constant 16 : index
    %50 = vector.load %arg15[%c0_33, %c16] : memref<8x32xbf16, #tpu.memory_space<vmem>>, vector<8x8xbf16>
    %c0_34 = arith.constant 0 : index
    %c16_35 = arith.constant 16 : index
    %51 = vector.load %arg14[%c0_34, %c16_35] : memref<8x64xbf16, #tpu.memory_space<vmem>>, vector<8x8xbf16>
    %cst_36 = arith.constant dense<0.000000e+00> : vector<8x8xf32>
    %52 = tpu.matmul %50, %51, %cst_36 {dimension_numbers = #tpu.dot_dimension_numbers<[1], [1], [0], [0], [0, 0, 1, 0], [], []>} : vector<8x8xbf16>, vector<8x8xbf16>, vector<8x8xf32> -> vector<8x8xf32>
    %cst_37 = arith.constant dense<0xFF800000> : vector<8xf32>
    %53 = vector.multi_reduction <maximumf>, %52, %cst_37 [1] : vector<8x8xf32> to vector<8xf32>
    %54 = vector.shape_cast %53 : vector<8xf32> to vector<8x1xf32>
    %55 = vector.broadcast %54 : vector<8x1xf32> to vector<8x8xf32>
    %56 = arith.subf %52, %55 : vector<8x8xf32>
    %57 = math.exp %56 : vector<8x8xf32>
    %cst_38 = arith.constant dense<0.000000e+00> : vector<8xf32>
    %58 = vector.multi_reduction <add>, %57, %cst_38 [1] : vector<8x8xf32> to vector<8xf32>
    %59 = vector.shape_cast %58 : vector<8xf32> to vector<8x1xf32>
    %60 = arith.truncf %57 : vector<8x8xf32> to vector<8x8xbf16>
    %c0_39 = arith.constant 0 : index
    %c48 = arith.constant 48 : index
    %61 = vector.load %arg14[%c0_39, %c48] : memref<8x64xbf16, #tpu.memory_space<vmem>>, vector<8x8xbf16>
    %cst_40 = arith.constant dense<0.000000e+00> : vector<8x8xf32>
    %62 = tpu.matmul %60, %61, %cst_40 {dimension_numbers = #tpu.dot_dimension_numbers<[1], [0], [0], [1], [0, 0, 1, 1], [], []>} : vector<8x8xbf16>, vector<8x8xbf16>, vector<8x8xf32> -> vector<8x8xf32>
    %63 = tpu.reciprocal %59 {approx = true} : vector<8x1xf32> -> vector<8x1xf32>
    %64 = vector.broadcast %63 : vector<8x1xf32> to vector<8x8xf32>
    %65 = arith.mulf %62, %64 : vector<8x8xf32>
    %66 = arith.truncf %65 : vector<8x8xf32> to vector<8x8xbf16>
    %c0_41 = arith.constant 0 : index
    %c16_42 = arith.constant 16 : index
    %67 = vector.load %arg16[%c0_41, %c16_42] : memref<8x32xbf16, #tpu.memory_space<vmem>>, vector<8x8xbf16>
    tpu.vector_store %arg16[%c0_41, %c16_42], %66 {strides = array<i32>} : memref<8x32xbf16, #tpu.memory_space<vmem>>, vector<8x8xbf16>,
    %c0_43 = arith.constant 0 : index
    %c24 = arith.constant 24 : index
    %68 = vector.load %arg15[%c0_43, %c24] : memref<8x32xbf16, #tpu.memory_space<vmem>>, vector<8x8xbf16>
    %c0_44 = arith.constant 0 : index
    %c24_45 = arith.constant 24 : index
    %69 = vector.load %arg14[%c0_44, %c24_45] : memref<8x64xbf16, #tpu.memory_space<vmem>>, vector<8x8xbf16>
    %cst_46 = arith.constant dense<0.000000e+00> : vector<8x8xf32>
    %70 = tpu.matmul %68, %69, %cst_46 {dimension_numbers = #tpu.dot_dimension_numbers<[1], [1], [0], [0], [0, 0, 1, 0], [], []>} : vector<8x8xbf16>, vector<8x8xbf16>, vector<8x8xf32> -> vector<8x8xf32>
    %cst_47 = arith.constant dense<0xFF800000> : vector<8xf32>
    %71 = vector.multi_reduction <maximumf>, %70, %cst_47 [1] : vector<8x8xf32> to vector<8xf32>
    %72 = vector.shape_cast %71 : vector<8xf32> to vector<8x1xf32>
    %73 = vector.broadcast %72 : vector<8x1xf32> to vector<8x8xf32>
    %74 = arith.subf %70, %73 : vector<8x8xf32>
    %75 = math.exp %74 : vector<8x8xf32>
    %cst_48 = arith.constant dense<0.000000e+00> : vector<8xf32>
    %76 = vector.multi_reduction <add>, %75, %cst_48 [1] : vector<8x8xf32> to vector<8xf32>
    %77 = vector.shape_cast %76 : vector<8xf32> to vector<8x1xf32>
    %78 = arith.truncf %75 : vector<8x8xf32> to vector<8x8xbf16>
    %c0_49 = arith.constant 0 : index
    %c56 = arith.constant 56 : index
    %79 = vector.load %arg14[%c0_49, %c56] : memref<8x64xbf16, #tpu.memory_space<vmem>>, vector<8x8xbf16>
    %cst_50 = arith.constant dense<0.000000e+00> : vector<8x8xf32>
    %80 = tpu.matmul %78, %79, %cst_50 {dimension_numbers = #tpu.dot_dimension_numbers<[1], [0], [0], [1], [0, 0, 1, 1], [], []>} : vector<8x8xbf16>, vector<8x8xbf16>, vector<8x8xf32> -> vector<8x8xf32>
    %81 = tpu.reciprocal %77 {approx = true} : vector<8x1xf32> -> vector<8x1xf32>
    %82 = vector.broadcast %81 : vector<8x1xf32> to vector<8x8xf32>
    %83 = arith.mulf %80, %82 : vector<8x8xf32>
    %84 = arith.truncf %83 : vector<8x8xf32> to vector<8x8xbf16>
    %c0_51 = arith.constant 0 : index
    %c24_52 = arith.constant 24 : index
    %85 = vector.load %arg16[%c0_51, %c24_52] : memref<8x32xbf16, #tpu.memory_space<vmem>>, vector<8x8xbf16>
    tpu.vector_store %arg16[%c0_51, %c24_52], %84 {strides = array<i32>} : memref<8x32xbf16, #tpu.memory_space<vmem>>, vector<8x8xbf16>,
    %c0_53 = arith.constant 0 : index
    %c0_54 = arith.constant 0 : index
    %86 = vector.load %arg16[%c0_53, %c0_54] : memref<8x32xbf16, #tpu.memory_space<vmem>>, vector<8x32xbf16>
    %c0_55 = arith.constant 0 : index
    %c0_56 = arith.constant 0 : index
    %c0_57 = arith.constant 0 : index
    %87 = vector.load %arg9[%c0_55, %c0_56, %c0_57] : memref<1x32x32xbf16, #tpu.memory_space<vmem>>, vector<1x32x32xbf16>
    %88 = vector.shape_cast %87 : vector<1x32x32xbf16> to vector<32x32xbf16>
    %cst_58 = arith.constant dense<0.000000e+00> : vector<8x32xf32>
    %89 = tpu.matmul %86, %88, %cst_58 {dimension_numbers = #tpu.dot_dimension_numbers<[1], [0], [0], [1], [0, 0, 1, 1], [], []>} : vector<8x32xbf16>, vector<32x32xbf16>, vector<8x32xf32> -> vector<8x32xf32>
    %c0_59 = arith.constant 0 : index
    %c0_60 = arith.constant 0 : index
    %c0_61 = arith.constant 0 : index
    %90 = vector.load %arg10[%c0_59, %c0_60, %c0_61] : memref<1x1x32xf32, #tpu.memory_space<vmem>>, vector<1x1x32xf32>
    %91 = vector.shape_cast %90 : vector<1x1x32xf32> to vector<1x32xf32>
    %92 = vector.broadcast %91 : vector<1x32xf32> to vector<8x32xf32>
    %93 = arith.addf %89, %92 : vector<8x32xf32>
    %c0_62 = arith.constant 0 : index
    %c0_63 = arith.constant 0 : index
    %c0_64 = arith.constant 0 : index
    %c0_65 = arith.constant 0 : index
    %94 = vector.load %arg3[%c0_62, %c0_63, %c0_64, %c0_65] : memref<1x1x8x32xbf16, #tpu.memory_space<vmem>>, vector<1x1x8x32xbf16>
    %95 = vector.shape_cast %94 : vector<1x1x8x32xbf16> to vector<8x32xbf16>
    %96 = arith.extf %95 : vector<8x32xbf16> to vector<8x32xf32>
    %97 = arith.addf %93, %96 : vector<8x32xf32>
    %cst_66 = arith.constant dense<0.000000e+00> : vector<8xf32>
    %98 = vector.multi_reduction <add>, %97, %cst_66 [1] : vector<8x32xf32> to vector<8xf32>
    %99 = vector.shape_cast %98 : vector<8xf32> to vector<8x1xf32>
    %cst_67 = arith.constant 3.200000e+01 : f32
    %100 = vector.broadcast %cst_67 : f32 to vector<8x1xf32>
    %101 = arith.divf %99, %100 : vector<8x1xf32>
    %102 = vector.broadcast %101 : vector<8x1xf32> to vector<8x32xf32>
    %103 = arith.subf %97, %102 : vector<8x32xf32>
    %104 = arith.mulf %103, %103 : vector<8x32xf32>
    %cst_68 = arith.constant dense<0.000000e+00> : vector<8xf32>
    %105 = vector.multi_reduction <add>, %104, %cst_68 [1] : vector<8x32xf32> to vector<8xf32>
    %106 = vector.shape_cast %105 : vector<8xf32> to vector<8x1xf32>
    %cst_69 = arith.constant 3.200000e+01 : f32
    %107 = vector.broadcast %cst_69 : f32 to vector<8x1xf32>
    %108 = arith.divf %106, %107 : vector<8x1xf32>
    %109 = vector.broadcast %101 : vector<8x1xf32> to vector<8x32xf32>
    %110 = arith.subf %97, %109 : vector<8x32xf32>
    %cst_70 = arith.constant 9.99999996E-13 : f32
    %111 = vector.broadcast %cst_70 : f32 to vector<8x1xf32>
    %112 = arith.addf %108, %111 : vector<8x1xf32>
    %113 = math.rsqrt %112 : vector<8x1xf32>
    %114 = vector.broadcast %113 : vector<8x1xf32> to vector<8x32xf32>
    %115 = arith.mulf %110, %114 : vector<8x32xf32>
    %c0_71 = arith.constant 0 : index
    %c0_72 = arith.constant 0 : index
    %c0_73 = arith.constant 0 : index
    %116 = vector.load %arg11[%c0_71, %c0_72, %c0_73] : memref<1x1x32xf32, #tpu.memory_space<vmem>>, vector<1x1x32xf32>
    %117 = vector.shape_cast %116 : vector<1x1x32xf32> to vector<1x32xf32>
    %118 = vector.broadcast %117 : vector<1x32xf32> to vector<8x32xf32>
    %119 = arith.mulf %115, %118 : vector<8x32xf32>
    %c0_74 = arith.constant 0 : index
    %c0_75 = arith.constant 0 : index
    %c0_76 = arith.constant 0 : index
    %120 = vector.load %arg12[%c0_74, %c0_75, %c0_76] : memref<1x1x32xf32, #tpu.memory_space<vmem>>, vector<1x1x32xf32>
    %121 = vector.shape_cast %120 : vector<1x1x32xf32> to vector<1x32xf32>
    %122 = vector.broadcast %121 : vector<1x32xf32> to vector<8x32xf32>
    %123 = arith.addf %119, %122 : vector<8x32xf32>
    %c0_77 = arith.constant 0 : index
    %c0_78 = arith.constant 0 : index
    %c0_79 = arith.constant 0 : index
    %c0_80 = arith.constant 0 : index
    %124 = vector.load %arg13[%c0_77, %c0_78, %c0_79, %c0_80] : memref<1x1x8x32xf32, #tpu.memory_space<vmem>>, vector<1x1x8x32xf32>
    %125 = vector.shape_cast %124 : vector<1x1x8x32xf32> to vector<8x32xf32>
    %126 = vector.shape_cast %123 : vector<8x32xf32> to vector<1x1x8x32xf32>
    tpu.vector_store %arg13[%c0_77, %c0_78, %c0_79, %c0_80], %126 {strides = array<i32>} : memref<1x1x8x32xf32, #tpu.memory_space<vmem>>, vector<1x1x8x32xf32>,
    return
  }
  func.func @transform_0(%arg0: i32, %arg1: i32, %arg2: i32) -> (i32, i32, i32, i32) {
    %c0_i32 = arith.constant 0 : i32
    %c0_i32_0 = arith.constant 0 : i32
    return %arg0, %arg1, %arg2, %c0_i32 : i32, i32, i32, i32
  }
  func.func @transform_1(%arg0: i32, %arg1: i32, %arg2: i32) -> (i32, i32, i32, i32) {
    %c0_i32 = arith.constant 0 : i32
    %c0_i32_0 = arith.constant 0 : i32
    %c0_i32_1 = arith.constant 0 : i32
    return %arg0, %arg1, %c0_i32, %c0_i32_0 : i32, i32, i32, i32
  }
  func.func @transform_2(%arg0: i32, %arg1: i32, %arg2: i32) -> (i32, i32, i32) {
    %c0_i32 = arith.constant 0 : i32
    %c0_i32_0 = arith.constant 0 : i32
    %c0_i32_1 = arith.constant 0 : i32
    return %arg0, %c0_i32, %c0_i32_0 : i32, i32, i32
  }
  func.func @transform_3(%arg0: i32, %arg1: i32, %arg2: i32) -> (i32, i32, i32) {
    %c0_i32 = arith.constant 0 : i32
    %c0_i32_0 = arith.constant 0 : i32
    %c0_i32_1 = arith.constant 0 : i32
    return %arg0, %c0_i32, %c0_i32_0 : i32, i32, i32
  }
  func.func @transform_4(%arg0: i32, %arg1: i32, %arg2: i32) -> (i32, i32, i32) {
    %c0_i32 = arith.constant 0 : i32
    %c0_i32_0 = arith.constant 0 : i32
    %c0_i32_1 = arith.constant 0 : i32
    return %arg0, %c0_i32, %c0_i32_0 : i32, i32, i32
  }
  func.func @transform_5(%arg0: i32, %arg1: i32, %arg2: i32) -> (i32, i32, i32) {
    %c0_i32 = arith.constant 0 : i32
    %c0_i32_0 = arith.constant 0 : i32
    %c0_i32_1 = arith.constant 0 : i32
    return %arg0, %c0_i32, %c0_i32_0 : i32, i32, i32
  }
  func.func @transform_6(%arg0: i32, %arg1: i32, %arg2: i32) -> (i32, i32, i32) {
    %c0_i32 = arith.constant 0 : i32
    %c0_i32_0 = arith.constant 0 : i32
    %c0_i32_1 = arith.constant 0 : i32
    return %arg0, %c0_i32, %c0_i32_0 : i32, i32, i32
  }
  func.func @transform_7(%arg0: i32, %arg1: i32, %arg2: i32) -> (i32, i32, i32) {
    %c0_i32 = arith.constant 0 : i32
    %c0_i32_0 = arith.constant 0 : i32
    %c0_i32_1 = arith.constant 0 : i32
    return %arg0, %c0_i32, %c0_i32_0 : i32, i32, i32
  }
  func.func @transform_8(%arg0: i32, %arg1: i32, %arg2: i32) -> (i32, i32, i32) {
    %c0_i32 = arith.constant 0 : i32
    %c0_i32_0 = arith.constant 0 : i32
    %c0_i32_1 = arith.constant 0 : i32
    return %arg0, %c0_i32, %c0_i32_0 : i32, i32, i32
  }
  func.func @transform_9(%arg0: i32, %arg1: i32, %arg2: i32) -> (i32, i32, i32) {
    %c0_i32 = arith.constant 0 : i32
    %c0_i32_0 = arith.constant 0 : i32
    %c0_i32_1 = arith.constant 0 : i32
    return %arg0, %c0_i32, %c0_i32_0 : i32, i32, i32
  }
  func.func @transform_10(%arg0: i32, %arg1: i32, %arg2: i32) -> (i32, i32, i32, i32) {
    %c0_i32 = arith.constant 0 : i32
    %c0_i32_0 = arith.constant 0 : i32
    return %arg0, %arg1, %arg2, %c0_i32 : i32, i32, i32, i32
  }
}

module attributes {stable_mosaic.version = 11 : i64} {
  func.func @_cross_attn_kernel(%arg0: i32, %arg1: i32, %arg2: i32, %arg3: memref<1x1x8x32xbf16, #tpu.memory_space<vmem>>, %arg4: memref<1x1x8x32xbf16, #tpu.memory_space<vmem>>, %arg5: memref<1x32x32xbf16, #tpu.memory_space<vmem>>, %arg6: memref<1x1x32xf32, #tpu.memory_space<vmem>>, %arg7: memref<1x32x64xbf16, #tpu.memory_space<vmem>>, %arg8: memref<1x1x64xf32, #tpu.memory_space<vmem>>, %arg9: memref<1x32x32xbf16, #tpu.memory_space<vmem>>, %arg10: memref<1x1x32xf32, #tpu.memory_space<vmem>>, %arg11: memref<1x1x32xf32, #tpu.memory_space<vmem>>, %arg12: memref<1x1x32xf32, #tpu.memory_space<vmem>>, %arg13: memref<1x1x8x32xf32, #tpu.memory_space<vmem>>, %arg14: memref<8x64xbf16, #tpu.memory_space<vmem>>, %arg15: memref<8x32xbf16, #tpu.memory_space<vmem>>, %arg16: memref<8x32xbf16, #tpu.memory_space<vmem>>) attributes {dimension_semantics = [#tpu.dimension_semantics<parallel>, #tpu.dimension_semantics<parallel>, #tpu.dimension_semantics<arbitrary>], iteration_bounds = array<i64: 2, 2, 1>, scalar_prefetch = 0 : i64, scratch_operands = 3 : i64, tpu.core_type = #tpu.core_type<tc>, window_params = [{transform_indices = @transform_0, window_bounds = array<i64: 1, 1, 8, 32>}, {transform_indices = @transform_1, window_bounds = array<i64: 1, 1, 8, 32>}, {transform_indices = @transform_2, window_bounds = array<i64: 1, 32, 32>}, {transform_indices = @transform_3, window_bounds = array<i64: 1, 1, 32>}, {transform_indices = @transform_4, window_bounds = array<i64: 1, 32, 64>}, {transform_indices = @transform_5, window_bounds = array<i64: 1, 1, 64>}, {transform_indices = @transform_6, window_bounds = array<i64: 1, 32, 32>}, {transform_indices = @transform_7, window_bounds = array<i64: 1, 1, 32>}, {transform_indices = @transform_8, window_bounds = array<i64: 1, 1, 32>}, {transform_indices = @transform_9, window_bounds = array<i64: 1, 1, 32>}, {transform_indices = @transform_10, window_bounds = array<i64: 1, 1, 8, 32>}]} {
    %c0_i32 = arith.constant 0 : i32
    %0 = arith.cmpi eq, %arg2, %c0_i32 : i32
    %1 = arith.extui %0 : i1 to i32
    %c0_i32_0 = arith.constant 0 : i32
    %2 = arith.cmpi ne, %1, %c0_i32_0 : i32
    scf.if %2 {
      %c0_81 = arith.constant 0 : index
      %c0_82 = arith.constant 0 : index
      %c0_83 = arith.constant 0 : index
      %c0_84 = arith.constant 0 : index
      %127 = vector.load %arg4[%c0_81, %c0_82, %c0_83, %c0_84] : memref<1x1x8x32xbf16, #tpu.memory_space<vmem>>, vector<1x1x8x32xbf16>
      %128 = vector.shape_cast %127 : vector<1x1x8x32xbf16> to vector<8x32xbf16>
      %c0_85 = arith.constant 0 : index
      %c0_86 = arith.constant 0 : index
      %c0_87 = arith.constant 0 : index
      %129 = vector.load %arg7[%c0_85, %c0_86, %c0_87] : memref<1x32x64xbf16, #tpu.memory_space<vmem>>, vector<1x32x64xbf16>
      %130 = vector.shape_cast %129 : vector<1x32x64xbf16> to vector<32x64xbf16>
      %cst_88 = arith.constant dense<0.000000e+00> : vector<8x64xf32>
      %131 = tpu.matmul %128, %130, %cst_88 {dimension_numbers = #tpu.dot_dimension_numbers<[1], [0], [0], [1], [0, 0, 1, 1], [], []>} : vector<8x32xbf16>, vector<32x64xbf16>, vector<8x64xf32> -> vector<8x64xf32>
      %c0_89 = arith.constant 0 : index
      %c0_90 = arith.constant 0 : index
      %c0_91 = arith.constant 0 : index
      %132 = vector.load %arg8[%c0_89, %c0_90, %c0_91] : memref<1x1x64xf32, #tpu.memory_space<vmem>>, vector<1x1x64xf32>
      %133 = vector.shape_cast %132 : vector<1x1x64xf32> to vector<1x64xf32>
      %134 = vector.broadcast %133 : vector<1x64xf32> to vector<8x64xf32>
      %135 = arith.addf %131, %134 : vector<8x64xf32>
      %136 = arith.truncf %135 : vector<8x64xf32> to vector<8x64xbf16>
      %c0_92 = arith.constant 0 : index
      %c0_93 = arith.constant 0 : index
      %137 = vector.load %arg14[%c0_92, %c0_93] : memref<8x64xbf16, #tpu.memory_space<vmem>>, vector<8x64xbf16>
      tpu.vector_store %arg14[%c0_92, %c0_93], %136 {strides = array<i32>} : memref<8x64xbf16, #tpu.memory_space<vmem>>, vector<8x64xbf16>,
    } else {
    }
    %c0 = arith.constant 0 : index
    %c0_1 = arith.constant 0 : index
    %c0_2 = arith.constant 0 : index
    %c0_3 = arith.constant 0 : index
    %3 = vector.load %arg3[%c0, %c0_1, %c0_2, %c0_3] : memref<1x1x8x32xbf16, #tpu.memory_space<vmem>>, vector<1x1x8x32xbf16>
    %4 = vector.shape_cast %3 : vector<1x1x8x32xbf16> to vector<8x32xbf16>
    %c0_4 = arith.constant 0 : index
    %c0_5 = arith.constant 0 : index
    %c0_6 = arith.constant 0 : index
    %5 = vector.load %arg5[%c0_4, %c0_5, %c0_6] : memref<1x32x32xbf16, #tpu.memory_space<vmem>>, vector<1x32x32xbf16>
    %6 = vector.shape_cast %5 : vector<1x32x32xbf16> to vector<32x32xbf16>
    %cst = arith.constant dense<0.000000e+00> : vector<8x32xf32>
    %7 = tpu.matmul %4, %6, %cst {dimension_numbers = #tpu.dot_dimension_numbers<[1], [0], [0], [1], [0, 0, 1, 1], [], []>} : vector<8x32xbf16>, vector<32x32xbf16>, vector<8x32xf32> -> vector<8x32xf32>
    %c0_7 = arith.constant 0 : index
    %c0_8 = arith.constant 0 : index
    %c0_9 = arith.constant 0 : index
    %8 = vector.load %arg6[%c0_7, %c0_8, %c0_9] : memref<1x1x32xf32, #tpu.memory_space<vmem>>, vector<1x1x32xf32>
    %9 = vector.shape_cast %8 : vector<1x1x32xf32> to vector<1x32xf32>
    %10 = vector.broadcast %9 : vector<1x32xf32> to vector<8x32xf32>
    %11 = arith.addf %7, %10 : vector<8x32xf32>
    %12 = arith.truncf %11 : vector<8x32xf32> to vector<8x32xbf16>
    %c0_10 = arith.constant 0 : index
    %c0_11 = arith.constant 0 : index
    %13 = vector.load %arg15[%c0_10, %c0_11] : memref<8x32xbf16, #tpu.memory_space<vmem>>, vector<8x32xbf16>
    tpu.vector_store %arg15[%c0_10, %c0_11], %12 {strides = array<i32>} : memref<8x32xbf16, #tpu.memory_space<vmem>>, vector<8x32xbf16>,
    %c0_12 = arith.constant 0 : index
    %c0_13 = arith.constant 0 : index
    %14 = vector.load %arg15[%c0_12, %c0_13] : memref<8x32xbf16, #tpu.memory_space<vmem>>, vector<8x8xbf16>
    %c0_14 = arith.constant 0 : index
    %c0_15 = arith.constant 0 : index
    %15 = vector.load %arg14[%c0_14, %c0_15] : memref<8x64xbf16, #tpu.memory_space<vmem>>, vector<8x8xbf16>
    %cst_16 = arith.constant dense<0.000000e+00> : vector<8x8xf32>
    %16 = tpu.matmul %14, %15, %cst_16 {dimension_numbers = #tpu.dot_dimension_numbers<[1], [1], [0], [0], [0, 0, 1, 0], [], []>} : vector<8x8xbf16>, vector<8x8xbf16>, vector<8x8xf32> -> vector<8x8xf32>
    %cst_17 = arith.constant dense<0xFF800000> : vector<8xf32>
    %17 = vector.multi_reduction <maximumf>, %16, %cst_17 [1] : vector<8x8xf32> to vector<8xf32>
    %18 = vector.shape_cast %17 : vector<8xf32> to vector<8x1xf32>
    %19 = vector.broadcast %18 : vector<8x1xf32> to vector<8x8xf32>
    %20 = arith.subf %16, %19 : vector<8x8xf32>
    %21 = math.exp %20 : vector<8x8xf32>
    %cst_18 = arith.constant dense<0.000000e+00> : vector<8xf32>
    %22 = vector.multi_reduction <add>, %21, %cst_18 [1] : vector<8x8xf32> to vector<8xf32>
    %23 = vector.shape_cast %22 : vector<8xf32> to vector<8x1xf32>
    %24 = arith.truncf %21 : vector<8x8xf32> to vector<8x8xbf16>
    %c0_19 = arith.constant 0 : index
    %c32 = arith.constant 32 : index
    %25 = vector.load %arg14[%c0_19, %c32] : memref<8x64xbf16, #tpu.memory_space<vmem>>, vector<8x8xbf16>
    %cst_20 = arith.constant dense<0.000000e+00> : vector<8x8xf32>
    %26 = tpu.matmul %24, %25, %cst_20 {dimension_numbers = #tpu.dot_dimension_numbers<[1], [0], [0], [1], [0, 0, 1, 1], [], []>} : vector<8x8xbf16>, vector<8x8xbf16>, vector<8x8xf32> -> vector<8x8xf32>
    %27 = tpu.reciprocal %23 {approx = true} : vector<8x1xf32> -> vector<8x1xf32>
    %28 = vector.broadcast %27 : vector<8x1xf32> to vector<8x8xf32>
    %29 = arith.mulf %26, %28 : vector<8x8xf32>
    %30 = arith.truncf %29 : vector<8x8xf32> to vector<8x8xbf16>
    %c0_21 = arith.constant 0 : index
    %c0_22 = arith.constant 0 : index
    %31 = vector.load %arg16[%c0_21, %c0_22] : memref<8x32xbf16, #tpu.memory_space<vmem>>, vector<8x8xbf16>
    tpu.vector_store %arg16[%c0_21, %c0_22], %30 {strides = array<i32>} : memref<8x32xbf16, #tpu.memory_space<vmem>>, vector<8x8xbf16>,
    %c0_23 = arith.constant 0 : index
    %c8 = arith.constant 8 : index
    %32 = vector.load %arg15[%c0_23, %c8] : memref<8x32xbf16, #tpu.memory_space<vmem>>, vector<8x8xbf16>
    %c0_24 = arith.constant 0 : index
    %c8_25 = arith.constant 8 : index
    %33 = vector.load %arg14[%c0_24, %c8_25] : memref<8x64xbf16, #tpu.memory_space<vmem>>, vector<8x8xbf16>
    %cst_26 = arith.constant dense<0.000000e+00> : vector<8x8xf32>
    %34 = tpu.matmul %32, %33, %cst_26 {dimension_numbers = #tpu.dot_dimension_numbers<[1], [1], [0], [0], [0, 0, 1, 0], [], []>} : vector<8x8xbf16>, vector<8x8xbf16>, vector<8x8xf32> -> vector<8x8xf32>
    %cst_27 = arith.constant dense<0xFF800000> : vector<8xf32>
    %35 = vector.multi_reduction <maximumf>, %34, %cst_27 [1] : vector<8x8xf32> to vector<8xf32>
    %36 = vector.shape_cast %35 : vector<8xf32> to vector<8x1xf32>
    %37 = vector.broadcast %36 : vector<8x1xf32> to vector<8x8xf32>
    %38 = arith.subf %34, %37 : vector<8x8xf32>
    %39 = math.exp %38 : vector<8x8xf32>
    %cst_28 = arith.constant dense<0.000000e+00> : vector<8xf32>
    %40 = vector.multi_reduction <add>, %39, %cst_28 [1] : vector<8x8xf32> to vector<8xf32>
    %41 = vector.shape_cast %40 : vector<8xf32> to vector<8x1xf32>
    %42 = arith.truncf %39 : vector<8x8xf32> to vector<8x8xbf16>
    %c0_29 = arith.constant 0 : index
    %c40 = arith.constant 40 : index
    %43 = vector.load %arg14[%c0_29, %c40] : memref<8x64xbf16, #tpu.memory_space<vmem>>, vector<8x8xbf16>
    %cst_30 = arith.constant dense<0.000000e+00> : vector<8x8xf32>
    %44 = tpu.matmul %42, %43, %cst_30 {dimension_numbers = #tpu.dot_dimension_numbers<[1], [0], [0], [1], [0, 0, 1, 1], [], []>} : vector<8x8xbf16>, vector<8x8xbf16>, vector<8x8xf32> -> vector<8x8xf32>
    %45 = tpu.reciprocal %41 {approx = true} : vector<8x1xf32> -> vector<8x1xf32>
    %46 = vector.broadcast %45 : vector<8x1xf32> to vector<8x8xf32>
    %47 = arith.mulf %44, %46 : vector<8x8xf32>
    %48 = arith.truncf %47 : vector<8x8xf32> to vector<8x8xbf16>
    %c0_31 = arith.constant 0 : index
    %c8_32 = arith.constant 8 : index
    %49 = vector.load %arg16[%c0_31, %c8_32] : memref<8x32xbf16, #tpu.memory_space<vmem>>, vector<8x8xbf16>
    tpu.vector_store %arg16[%c0_31, %c8_32], %48 {strides = array<i32>} : memref<8x32xbf16, #tpu.memory_space<vmem>>, vector<8x8xbf16>,
    %c0_33 = arith.constant 0 : index
    %c16 = arith.constant 16 : index
    %50 = vector.load %arg15[%c0_33, %c16] : memref<8x32xbf16, #tpu.memory_space<vmem>>, vector<8x8xbf16>
    %c0_34 = arith.constant 0 : index
    %c16_35 = arith.constant 16 : index
    %51 = vector.load %arg14[%c0_34, %c16_35] : memref<8x64xbf16, #tpu.memory_space<vmem>>, vector<8x8xbf16>
    %cst_36 = arith.constant dense<0.000000e+00> : vector<8x8xf32>
    %52 = tpu.matmul %50, %51, %cst_36 {dimension_numbers = #tpu.dot_dimension_numbers<[1], [1], [0], [0], [0, 0, 1, 0], [], []>} : vector<8x8xbf16>, vector<8x8xbf16>, vector<8x8xf32> -> vector<8x8xf32>
    %cst_37 = arith.constant dense<0xFF800000> : vector<8xf32>
    %53 = vector.multi_reduction <maximumf>, %52, %cst_37 [1] : vector<8x8xf32> to vector<8xf32>
    %54 = vector.shape_cast %53 : vector<8xf32> to vector<8x1xf32>
    %55 = vector.broadcast %54 : vector<8x1xf32> to vector<8x8xf32>
    %56 = arith.subf %52, %55 : vector<8x8xf32>
    %57 = math.exp %56 : vector<8x8xf32>
    %cst_38 = arith.constant dense<0.000000e+00> : vector<8xf32>
    %58 = vector.multi_reduction <add>, %57, %cst_38 [1] : vector<8x8xf32> to vector<8xf32>
    %59 = vector.shape_cast %58 : vector<8xf32> to vector<8x1xf32>
    %60 = arith.truncf %57 : vector<8x8xf32> to vector<8x8xbf16>
    %c0_39 = arith.constant 0 : index
    %c48 = arith.constant 48 : index
    %61 = vector.load %arg14[%c0_39, %c48] : memref<8x64xbf16, #tpu.memory_space<vmem>>, vector<8x8xbf16>
    %cst_40 = arith.constant dense<0.000000e+00> : vector<8x8xf32>
    %62 = tpu.matmul %60, %61, %cst_40 {dimension_numbers = #tpu.dot_dimension_numbers<[1], [0], [0], [1], [0, 0, 1, 1], [], []>} : vector<8x8xbf16>, vector<8x8xbf16>, vector<8x8xf32> -> vector<8x8xf32>
    %63 = tpu.reciprocal %59 {approx = true} : vector<8x1xf32> -> vector<8x1xf32>
    %64 = vector.broadcast %63 : vector<8x1xf32> to vector<8x8xf32>
    %65 = arith.mulf %62, %64 : vector<8x8xf32>
    %66 = arith.truncf %65 : vector<8x8xf32> to vector<8x8xbf16>
    %c0_41 = arith.constant 0 : index
    %c16_42 = arith.constant 16 : index
    %67 = vector.load %arg16[%c0_41, %c16_42] : memref<8x32xbf16, #tpu.memory_space<vmem>>, vector<8x8xbf16>
    tpu.vector_store %arg16[%c0_41, %c16_42], %66 {strides = array<i32>} : memref<8x32xbf16, #tpu.memory_space<vmem>>, vector<8x8xbf16>,
    %c0_43 = arith.constant 0 : index
    %c24 = arith.constant 24 : index
    %68 = vector.load %arg15[%c0_43, %c24] : memref<8x32xbf16, #tpu.memory_space<vmem>>, vector<8x8xbf16>
    %c0_44 = arith.constant 0 : index
    %c24_45 = arith.constant 24 : index
    %69 = vector.load %arg14[%c0_44, %c24_45] : memref<8x64xbf16, #tpu.memory_space<vmem>>, vector<8x8xbf16>
    %cst_46 = arith.constant dense<0.000000e+00> : vector<8x8xf32>
    %70 = tpu.matmul %68, %69, %cst_46 {dimension_numbers = #tpu.dot_dimension_numbers<[1], [1], [0], [0], [0, 0, 1, 0], [], []>} : vector<8x8xbf16>, vector<8x8xbf16>, vector<8x8xf32> -> vector<8x8xf32>
    %cst_47 = arith.constant dense<0xFF800000> : vector<8xf32>
    %71 = vector.multi_reduction <maximumf>, %70, %cst_47 [1] : vector<8x8xf32> to vector<8xf32>
    %72 = vector.shape_cast %71 : vector<8xf32> to vector<8x1xf32>
    %73 = vector.broadcast %72 : vector<8x1xf32> to vector<8x8xf32>
    %74 = arith.subf %70, %73 : vector<8x8xf32>
    %75 = math.exp %74 : vector<8x8xf32>
    %cst_48 = arith.constant dense<0.000000e+00> : vector<8xf32>
    %76 = vector.multi_reduction <add>, %75, %cst_48 [1] : vector<8x8xf32> to vector<8xf32>
    %77 = vector.shape_cast %76 : vector<8xf32> to vector<8x1xf32>
    %78 = arith.truncf %75 : vector<8x8xf32> to vector<8x8xbf16>
    %c0_49 = arith.constant 0 : index
    %c56 = arith.constant 56 : index
    %79 = vector.load %arg14[%c0_49, %c56] : memref<8x64xbf16, #tpu.memory_space<vmem>>, vector<8x8xbf16>
    %cst_50 = arith.constant dense<0.000000e+00> : vector<8x8xf32>
    %80 = tpu.matmul %78, %79, %cst_50 {dimension_numbers = #tpu.dot_dimension_numbers<[1], [0], [0], [1], [0, 0, 1, 1], [], []>} : vector<8x8xbf16>, vector<8x8xbf16>, vector<8x8xf32> -> vector<8x8xf32>
    %81 = tpu.reciprocal %77 {approx = true} : vector<8x1xf32> -> vector<8x1xf32>
    %82 = vector.broadcast %81 : vector<8x1xf32> to vector<8x8xf32>
    %83 = arith.mulf %80, %82 : vector<8x8xf32>
    %84 = arith.truncf %83 : vector<8x8xf32> to vector<8x8xbf16>
    %c0_51 = arith.constant 0 : index
    %c24_52 = arith.constant 24 : index
    %85 = vector.load %arg16[%c0_51, %c24_52] : memref<8x32xbf16, #tpu.memory_space<vmem>>, vector<8x8xbf16>
    tpu.vector_store %arg16[%c0_51, %c24_52], %84 {strides = array<i32>} : memref<8x32xbf16, #tpu.memory_space<vmem>>, vector<8x8xbf16>,
    %c0_53 = arith.constant 0 : index
    %c0_54 = arith.constant 0 : index
    %86 = vector.load %arg16[%c0_53, %c0_54] : memref<8x32xbf16, #tpu.memory_space<vmem>>, vector<8x32xbf16>
    %c0_55 = arith.constant 0 : index
    %c0_56 = arith.constant 0 : index
    %c0_57 = arith.constant 0 : index
    %87 = vector.load %arg9[%c0_55, %c0_56, %c0_57] : memref<1x32x32xbf16, #tpu.memory_space<vmem>>, vector<1x32x32xbf16>
    %88 = vector.shape_cast %87 : vector<1x32x32xbf16> to vector<32x32xbf16>
    %cst_58 = arith.constant dense<0.000000e+00> : vector<8x32xf32>
    %89 = tpu.matmul %86, %88, %cst_58 {dimension_numbers = #tpu.dot_dimension_numbers<[1], [0], [0], [1], [0, 0, 1, 1], [], []>} : vector<8x32xbf16>, vector<32x32xbf16>, vector<8x32xf32> -> vector<8x32xf32>
    %c0_59 = arith.constant 0 : index
    %c0_60 = arith.constant 0 : index
    %c0_61 = arith.constant 0 : index
    %90 = vector.load %arg10[%c0_59, %c0_60, %c0_61] : memref<1x1x32xf32, #tpu.memory_space<vmem>>, vector<1x1x32xf32>
    %91 = vector.shape_cast %90 : vector<1x1x32xf32> to vector<1x32xf32>
    %92 = vector.broadcast %91 : vector<1x32xf32> to vector<8x32xf32>
    %93 = arith.addf %89, %92 : vector<8x32xf32>
    %c0_62 = arith.constant 0 : index
    %c0_63 = arith.constant 0 : index
    %c0_64 = arith.constant 0 : index
    %c0_65 = arith.constant 0 : index
    %94 = vector.load %arg3[%c0_62, %c0_63, %c0_64, %c0_65] : memref<1x1x8x32xbf16, #tpu.memory_space<vmem>>, vector<1x1x8x32xbf16>
    %95 = vector.shape_cast %94 : vector<1x1x8x32xbf16> to vector<8x32xbf16>
    %96 = arith.extf %95 : vector<8x32xbf16> to vector<8x32xf32>
    %97 = arith.addf %93, %96 : vector<8x32xf32>
    %cst_66 = arith.constant dense<0.000000e+00> : vector<8xf32>
    %98 = vector.multi_reduction <add>, %97, %cst_66 [1] : vector<8x32xf32> to vector<8xf32>
    %99 = vector.shape_cast %98 : vector<8xf32> to vector<8x1xf32>
    %cst_67 = arith.constant 3.200000e+01 : f32
    %100 = vector.broadcast %cst_67 : f32 to vector<8x1xf32>
    %101 = arith.divf %99, %100 : vector<8x1xf32>
    %102 = vector.broadcast %101 : vector<8x1xf32> to vector<8x32xf32>
    %103 = arith.subf %97, %102 : vector<8x32xf32>
    %104 = arith.mulf %103, %103 : vector<8x32xf32>
    %cst_68 = arith.constant dense<0.000000e+00> : vector<8xf32>
    %105 = vector.multi_reduction <add>, %104, %cst_68 [1] : vector<8x32xf32> to vector<8xf32>
    %106 = vector.shape_cast %105 : vector<8xf32> to vector<8x1xf32>
    %cst_69 = arith.constant 3.200000e+01 : f32
    %107 = vector.broadcast %cst_69 : f32 to vector<8x1xf32>
    %108 = arith.divf %106, %107 : vector<8x1xf32>
    %109 = vector.broadcast %101 : vector<8x1xf32> to vector<8x32xf32>
    %110 = arith.subf %97, %109 : vector<8x32xf32>
    %cst_70 = arith.constant 9.99999996E-13 : f32
    %111 = vector.broadcast %cst_70 : f32 to vector<8x1xf32>
    %112 = arith.addf %108, %111 : vector<8x1xf32>
    %113 = math.rsqrt %112 : vector<8x1xf32>
    %114 = vector.broadcast %113 : vector<8x1xf32> to vector<8x32xf32>
    %115 = arith.mulf %110, %114 : vector<8x32xf32>
    %c0_71 = arith.constant 0 : index
    %c0_72 = arith.constant 0 : index
    %c0_73 = arith.constant 0 : index
    %116 = vector.load %arg11[%c0_71, %c0_72, %c0_73] : memref<1x1x32xf32, #tpu.memory_space<vmem>>, vector<1x1x32xf32>
    %117 = vector.shape_cast %116 : vector<1x1x32xf32> to vector<1x32xf32>
    %118 = vector.broadcast %117 : vector<1x32xf32> to vector<8x32xf32>
    %119 = arith.mulf %115, %118 : vector<8x32xf32>
    %c0_74 = arith.constant 0 : index
    %c0_75 = arith.constant 0 : index
    %c0_76 = arith.constant 0 : index
    %120 = vector.load %arg12[%c0_74, %c0_75, %c0_76] : memref<1x1x32xf32, #tpu.memory_space<vmem>>, vector<1x1x32xf32>
    %121 = vector.shape_cast %120 : vector<1x1x32xf32> to vector<1x32xf32>
    %122 = vector.broadcast %121 : vector<1x32xf32> to vector<8x32xf32>
    %123 = arith.addf %119, %122 : vector<8x32xf32>
    %c0_77 = arith.constant 0 : index
    %c0_78 = arith.constant 0 : index
    %c0_79 = arith.constant 0 : index
    %c0_80 = arith.constant 0 : index
    %124 = vector.load %arg13[%c0_77, %c0_78, %c0_79, %c0_80] : memref<1x1x8x32xf32, #tpu.memory_space<vmem>>, vector<1x1x8x32xf32>
    %125 = vector.shape_cast %124 : vector<1x1x8x32xf32> to vector<8x32xf32>
    %126 = vector.shape_cast %123 : vector<8x32xf32> to vector<1x1x8x32xf32>
    tpu.vector_store %arg13[%c0_77, %c0_78, %c0_79, %c0_80], %126 {strides = array<i32>} : memref<1x1x8x32xf32, #tpu.memory_space<vmem>>, vector<1x1x8x32xf32>,
    return
  }
  func.func @transform_0(%arg0: i32, %arg1: i32, %arg2: i32) -> (i32, i32, i32, i32) {
    %c0_i32 = arith.constant 0 : i32
    %c0_i32_0 = arith.constant 0 : i32
    return %arg0, %arg1, %arg2, %c0_i32 : i32, i32, i32, i32
  }
  func.func @transform_1(%arg0: i32, %arg1: i32, %arg2: i32) -> (i32, i32, i32, i32) {
    %c0_i32 = arith.constant 0 : i32
    %c0_i32_0 = arith.constant 0 : i32
    %c0_i32_1 = arith.constant 0 : i32
    return %arg0, %arg1, %c0_i32, %c0_i32_0 : i32, i32, i32, i32
  }
  func.func @transform_2(%arg0: i32, %arg1: i32, %arg2: i32) -> (i32, i32, i32) {
    %c0_i32 = arith.constant 0 : i32
    %c0_i32_0 = arith.constant 0 : i32
    %c0_i32_1 = arith.constant 0 : i32
    return %arg0, %c0_i32, %c0_i32_0 : i32, i32, i32
  }
  func.func @transform_3(%arg0: i32, %arg1: i32, %arg2: i32) -> (i32, i32, i32) {
    %c0_i32 = arith.constant 0 : i32
    %c0_i32_0 = arith.constant 0 : i32
    %c0_i32_1 = arith.constant 0 : i32
    return %arg0, %c0_i32, %c0_i32_0 : i32, i32, i32
  }
  func.func @transform_4(%arg0: i32, %arg1: i32, %arg2: i32) -> (i32, i32, i32) {
    %c0_i32 = arith.constant 0 : i32
    %c0_i32_0 = arith.constant 0 : i32
    %c0_i32_1 = arith.constant 0 : i32
    return %arg0, %c0_i32, %c0_i32_0 : i32, i32, i32
  }
  func.func @transform_5(%arg0: i32, %arg1: i32, %arg2: i32) -> (i32, i32, i32) {
    %c0_i32 = arith.constant 0 : i32
    %c0_i32_0 = arith.constant 0 : i32
    %c0_i32_1 = arith.constant 0 : i32
    return %arg0, %c0_i32, %c0_i32_0 : i32, i32, i32
  }
  func.func @transform_6(%arg0: i32, %arg1: i32, %arg2: i32) -> (i32, i32, i32) {
    %c0_i32 = arith.constant 0 : i32
    %c0_i32_0 = arith.constant 0 : i32
    %c0_i32_1 = arith.constant 0 : i32
    return %arg0, %c0_i32, %c0_i32_0 : i32, i32, i32
  }
  func.func @transform_7(%arg0: i32, %arg1: i32, %arg2: i32) -> (i32, i32, i32) {
    %c0_i32 = arith.constant 0 : i32
    %c0_i32_0 = arith.constant 0 : i32
    %c0_i32_1 = arith.constant 0 : i32
    return %arg0, %c0_i32, %c0_i32_0 : i32, i32, i32
  }
  func.func @transform_8(%arg0: i32, %arg1: i32, %arg2: i32) -> (i32, i32, i32) {
    %c0_i32 = arith.constant 0 : i32
    %c0_i32_0 = arith.constant 0 : i32
    %c0_i32_1 = arith.constant 0 : i32
    return %arg0, %c0_i32, %c0_i32_0 : i32, i32, i32
  }
  func.func @transform_9(%arg0: i32, %arg1: i32, %arg2: i32) -> (i32, i32, i32) {
    %c0_i32 = arith.constant 0 : i32
    %c0_i32_0 = arith.constant 0 : i32
    %c0_i32_1 = arith.constant 0 : i32
    return %arg0, %c0_i32, %c0_i32_0 : i32, i32, i32
  }
  func.func @transform_10(%arg0: i32, %arg1: i32, %arg2: i32) -> (i32, i32, i32, i32) {
    %c0_i32 = arith.constant 0 : i32
    %c0_i32_0 = arith.constant 0 : i32
    return %arg0, %arg1, %arg2, %c0_i32 : i32, i32, i32, i32
  }
}

</mosaic_0001>

<bundles_post_ra>
// kernel: tpu_custom_call.1
= control target key start
LH: loop header
LB: loop body
LE: loop exit
PB: predicated region body
PF: predicated region fallthrough
CT: control target
= control target key end

     0   :  { %s2740_s0 = inlined_call_operand.hbm [shape: bf16[2,2,8,32], index: 0, kind: input, shape index: {}]   ;;  %s2741_s1 = inlined_call_operand.hbm [shape: bf16[2,2,8,32], index: 1, kind: input, shape index: {}]   ;;  %s2742_s2 = inlined_call_operand.hbm [shape: bf16[2,32,32], index: 2, kind: input, shape index: {}]   ;;  %s2743_s3 = inlined_call_operand.vmem [shape: f32[2,1,32], index: 3, kind: input, shape index: {}]   ;;  %s2744_s4 = inlined_call_operand.hbm [shape: bf16[2,32,64], index: 4, kind: input, shape index: {}]   ;;  %s2745_s5 = inlined_call_operand.vmem [shape: f32[2,1,64], index: 5, kind: input, shape index: {}]   ;;  %s2746_s6 = inlined_call_operand.hbm [shape: bf16[2,32,32], index: 6, kind: input, shape index: {}]   ;;  %s2747_s7 = inlined_call_operand.vmem [shape: f32[2,1,32], index: 7, kind: input, shape index: {}]   ;;  %s2748_s8 = inlined_call_operand.vmem [shape: f32[2,1,32], index: 8, kind: input, shape index: {}]   ;;  %s2749_s9 = inlined_call_operand.vmem [shape: f32[2,1,32], index: 9, kind: input, shape index: {}]   ;;  %s2750_s10 = inlined_call_operand.hbm [shape: f32[2,2,8,32], index: 10, kind: output, shape index: {}]  }
   0x1   :  { %2766 = sst [smem:[#allocation28_spill]] %s2742_s2 }
   0x2   :  { %2767 = sst [smem:[#allocation29_spill]] %s2743_s3 }
   0x3   :  { %2768 = sst [smem:[#allocation30_spill]] %s2744_s4 }
   0x4   :  { %2769 = sst [smem:[#allocation31_spill]] %s2746_s6 }
   0x5   :  { %2770 = sst [smem:[#allocation32_spill]] %s2747_s7 }
   0x6   :  { %2771 = sst [smem:[#allocation33_spill]] %s2748_s8 }
   0x7   :  { %2772 = sst [smem:[#allocation34_spill]] %s2749_s9 }
   0x8   :  { %2773 = sst [smem:[#allocation35_spill]] %s2750_s10 }
   0x9   :  { %15 = vsyncpa [#allocation6], 0 }
   0xa   :  { %17 = vsyncpa [#allocation6 + $0x1], 0 }
   0xb   :  { %18 = vsyncpa [#allocation9], 0 }
   0xc   :  { %20 = vsyncpa [#allocation9 + $0x1], 0 }
   0xd   :  { %21 = vsyncpa [#allocation12], 0 }
   0xe   :  { %22 = vsyncpa [#allocation7], 0 }
   0xf   :  { %24 = vsyncpa [#allocation7 + $0x1], 0  ;;  %s2246_s13 = smov 0   ;;  %s2248_s14 = smov 0  }
  0x10   :  { %s2250_s15 = smov 0   ;;  %s2252_s16 = smov 0  }
  0x11   :  { %s2254_s17 = smov 0   ;;  %s2256_s18 = smov 0  }
  0x12   :  { %s2258_s19 = smov 0   ;;  %s2260_s20 = smov 0  }
  0x13   :  { %s2262_s21 = smov 0   ;;  %s2264_s22 = smov 0  }
  0x14   :  { %s2266_s23 = smov 0  }
  0x15 LB: > { %2774 = sst [smem:[#allocation20_spill]] %s2133_s14  ;;  %s2300_s24 = sadd.s32 4294967295, %s2169_s23   ;;  %s2169_s23 = sphi %s2266_s23, %s30_s23   ;;  %s2165_s22 = sphi %s2264_s22, %s2815_s22   ;;  %s2161_s21 = sphi %s2262_s21, %s2814_s21   ;;  %s2157_s20 = sphi %s2260_s20, %s2813_s20   ;;  %s2153_s19 = sphi %s2258_s19, %s2812_s19   ;;  %s2149_s18 = sphi %s2256_s18, %s2811_s18   ;;  %s2145_s17 = sphi %s2254_s17, %s2819_s17   ;;  %s2141_s16 = sphi %s2252_s16, %s2818_s16   ;;  %s2137_s15 = sphi %s2250_s15, %s2817_s15   ;;  %s2133_s14 = sphi %s2248_s14, %s2816_s14   ;;  %s2129_s13 = sphi %s2246_s13, %s2809_s13  }
  0x16   : > { %2775 = sst [smem:[#allocation21_spill]] %s2149_s18  ;;  %p127_p0 = scmp.ne.s32.totalorder %s2133_s14, %s2129_s13 }
  0x17   : > { %2776 = sst [smem:[#allocation22_spill]] %s2153_s19  ;;  %p2753_p1 = scmp.eq.s32.totalorder %s2300_s24, 0 }
  0x18   : > { %2777 = sst [smem:[#allocation23_spill]] %s2161_s21  ;;  %p1556_p2 = scmp.ge.s32.totalorder %s2169_s23, 1 }
  0x19   : > { %2778 = sst [smem:[#allocation24_spill]] %s2165_s22  ;;  %p350_p3 = scmp.lt.s32.totalorder %s2169_s23, 5 }
  0x1a   : > { %s1611_s25 = sshll.u32 %s2157_s20, 8  ;;  %p2309_p4 = por %p127_p0, %p2753_p1 }
  0x1b   : > { %s2780_s2 = sld [smem:[#allocation28_spill]]  ;;  %p2318_p5 = pnand %p1556_p2, %p350_p3 }
  0x1c   : > { %s2779_s26 = scalar_select %p2309_p4, 1, 0 }
  0x1d   : > { %s2781_s30 = scalar_select %p2318_p5, 1, 0 }
  0x1e   : > { %s2171_s11 = smov [#allocation10]   ;;  %p1726_p6 = pneg %p2318_p5 }
  0x1f   : > { %s365_s12 = sshll.u32 %s2171_s11, 4  ;;  %s2783_s4 = sld [smem:[#allocation30_spill]]  ;;  %s2324_s12 = int_to_ptr.vmem [resolvable:$true] %s365_s12 }
  0x20   : > { %p2328_p7 = pnand %p1726_p6, %p2309_p4  ;;  %s2784_s6 = sld [smem:[#allocation31_spill]] }
  0x21   : > { %s2316_s29 = scalar_lea.hbm %s2780_s2, %s1611_s25  ;;  %s2172_s8 = smov [#allocation11]  }
  0x22   : > { %s2782_s13 = scalar_select %p2328_p7, 1, 0 }
  0x23   : > { %s2342_s19 = sshll.u32 %s2172_s8, 4  ;;  %s1885_s7 = scalar_lea.hbm %s2316_s29, 256  ;;  %s388_s19 = int_to_ptr.vmem [resolvable:$true] %s2342_s19 }
  0x24   : > { %p1886_p8 = scmp.ne.s32.totalorder %s2316_s29, %s1885_s7  ;;  %p2348_p9 = pneg %p2328_p7 }
  0x25   : > { %s2335_s14 = scalar_lea.hbm %s2783_s4, %s1611_s25  ;;  %s1890_s9 = scalar_lea.hbm %s2780_s2, 512 }
  0x26   : > { %s2340_s11 = scalar_lea.hbm %s2784_s6, %s1611_s25  ;;  %p1888_p10 = pnand %p2348_p9, %p1886_p8 }
  0x27   : > { %p1891_p12 = scmp.lt.u32.totalorder %s2316_s29, %s2780_s2  ;;  %p1892_p13 = scmp.lt.u32.totalorder %s1890_s9, %s1885_s7 }
  0x28   : > { %p1889_p11 = pneg %p1888_p10  ;;  %p1894_p2 = scmp.lt.u32.totalorder %s1885_s7, %s2316_s29 }
  0x29   : > { %p1893_p0 = por %p1892_p13, %p1891_p12 }
  0x2b   : > { %p1895_p3 = por %p1894_p2, %p1893_p0 }
  0x2d   : > { %p1896_p6 = pnand %p1895_p3, %p1889_p11 }
  0x2f   : > { %1899 = shalt.err (!%p1896_p6)
}
  0x30   : > { %s1900_s8 = scalar_lea.vmem %s2324_s12, 256  ;;  %p1908_p4 = scmp.lt.s32.totalorder %s2324_s12, %s2324_s12 }
  0x31   : > { %p1901_p8 = scmp.ne.s32.totalorder %s2324_s12, %s1900_s8  ;;  %p1909_p5 = scmp.lt.s32.totalorder %s1900_s8, %s1900_s8 }
  0x33   : > { %p1903_p10 = pnand %p1901_p8, %p2348_p9  ;;  %p1910_p7 = por %p1909_p5, %p1908_p4 }
  0x35   : > { %p1904_p1 = pneg %p1903_p10 }
  0x37   : > { %p1911_p12 = pnand %p1910_p7, %p1904_p1 }
  0x39   : > { %1914 = shalt.err (!%p1911_p12)
}
  0x3a   : > { %s2173_s27 = smov 64   ;;  %s2174_s7 = smov 4  }
  0x3b   : > { %p2786_p11 = scmp.ne.s32.totalorder %s2782_s13, 0  ;;  %s1915_s28 = scalar_lea.hbm %s2335_s14, 256 }
  0x3c   : > { %p1916_p1 = scmp.ne.s32.totalorder %s2335_s14, %s1915_s28  ;;  %s1920_s25 = scalar_lea.hbm %s2783_s4, 512 }
  0x3d   : > { %1729 = dma.hbm_to_vmem [thread:$0]  (!%p2786_p11), %s2316_s29, 256, %s2324_s12, [#allocation9], %s2173_s27, %s2173_s27, %s2174_s7  }
  0x3e   : > { %p1918_p4 = pnand %p1916_p1, %p2348_p9  ;;  %p1921_p7 = scmp.lt.u32.totalorder %s2335_s14, %s2783_s4 }
  0x3f   : > { %p1922_p13 = scmp.lt.u32.totalorder %s1920_s25, %s1915_s28  ;;  %p1924_p2 = scmp.lt.u32.totalorder %s1915_s28, %s2335_s14 }
  0x40   : > { %p1919_p5 = pneg %p1918_p4 }
  0x41   : > { %p1923_p0 = por %p1922_p13, %p1921_p7 }
  0x43   : > { %p1925_p3 = por %p1924_p2, %p1923_p0 }
  0x45   : > { %p1926_p6 = pnand %p1925_p3, %p1919_p5 }
  0x47   : > { %1929 = shalt.err (!%p1926_p6)
}
  0x48   : > { %s1930_s29 = scalar_lea.vmem %s388_s19, 256  ;;  %p1938_p1 = scmp.lt.s32.totalorder %s388_s19, %s388_s19 }
  0x49   : > { %p1931_p8 = scmp.ne.s32.totalorder %s388_s19, %s1930_s29  ;;  %p1939_p4 = scmp.lt.s32.totalorder %s1930_s29, %s1930_s29 }
  0x4b   : > { %p1933_p10 = pnand %p1931_p8, %p2348_p9  ;;  %p1940_p11 = por %p1939_p4, %p1938_p1 }
  0x4d   : > { %p1934_p12 = pneg %p1933_p10 }
  0x4f   : > { %p1941_p7 = pnand %p1940_p11, %p1934_p12 }
  0x51   : > { %1944 = shalt.err (!%p1941_p7)
}
  0x52   : > { %p2787_p13 = scmp.ne.s32.totalorder %s2782_s13, 0  ;;  %s2175_s2 = smov [#allocation13]  }
  0x53   : > { %s409_s12 = sshll.u32 %s2175_s2, 4  ;;  %s1945_s28 = scalar_lea.hbm %s2340_s11, 256  ;;  %s410_s12 = int_to_ptr.vmem [resolvable:$true] %s409_s12 }
  0x54   : > { %1732 = dma.hbm_to_vmem [thread:$0]  (!%p2787_p13), %s2335_s14, 256, %s388_s19, [#allocation12], %s2173_s27, %s2173_s27, %s2174_s7  }
  0x55   : > { %p1946_p5 = scmp.ne.s32.totalorder %s2340_s11, %s1945_s28  ;;  %s1950_s25 = scalar_lea.hbm %s2784_s6, 512 }
  0x56   : > { %p1951_p2 = scmp.lt.u32.totalorder %s2340_s11, %s2784_s6  ;;  %p1952_p3 = scmp.lt.u32.totalorder %s1950_s25, %s1945_s28 }
  0x57   : > { %p1948_p11 = pnand %p1946_p5, %p2348_p9  ;;  %p1954_p8 = scmp.lt.u32.totalorder %s1945_s28, %s2340_s11 }
  0x58   : > { %p1953_p6 = por %p1952_p3, %p1951_p2 }
  0x59   : > { %p1949_p0 = pneg %p1948_p11 }
  0x5a   : > { %p1955_p10 = por %p1954_p8, %p1953_p6 }
  0x5c   : > { %p1956_p12 = pnand %p1955_p10, %p1949_p0 }
  0x5e   : > { %1959 = shalt.err (!%p1956_p12)
}
  0x5f   : > { %s1960_s14 = scalar_lea.vmem %s410_s12, 256  ;;  %p1968_p5 = scmp.lt.s32.totalorder %s410_s12, %s410_s12 }
  0x60   : > { %p1961_p1 = scmp.ne.s32.totalorder %s410_s12, %s1960_s14  ;;  %p1969_p11 = scmp.lt.s32.totalorder %s1960_s14, %s1960_s14 }
  0x62   : > { %p1963_p4 = pnand %p1961_p1, %p2348_p9  ;;  %p1970_p13 = por %p1969_p11, %p1968_p5 }
  0x64   : > { %p1964_p7 = pneg %p1963_p4 }
  0x66   : > { %p1971_p2 = pnand %p1970_p13, %p1964_p7 }
  0x68   : > { %1974 = shalt.err (!%p1971_p2)
}
  0x69   : > { %p2788_p3 = scmp.ne.s32.totalorder %s2782_s13, 0  ;;  %s1555_s3 = sadd.s32 4294967294, %s2169_s23  }
  0x6a   : > { %s45_s19 = sadd.s32 1, %s2161_s21  ;;  %s49_s13 = sadd.s32 1, %s2165_s22 }
  0x6b   : > { %1735 = dma.hbm_to_vmem [thread:$0]  (!%p2788_p3), %s2340_s11, 256, %s410_s12, [#allocation12], %s2173_s27, %s2173_s27, %s2174_s7  }
  0x6c   : > { %p47_p9 = scmp.ge.s32.totalorder %s45_s19, 2  ;;  %s60_s2 = sadd.s32 1, %s2149_s18 }
  0x6d   : > { %p67_p13 = scmp.ne.s32.totalorder %s2149_s18, %s2145_s17  ;;  %p68_p0 = scmp.eq.s32.totalorder %s2169_s23, 0 }
  0x6e   : > { %s2821_s19 = smov (%p47_p9, %s45_s19), 0  ;;  %s2823_s13 = smov (!%p47_p9, %s49_s13), %s2165_s22 }
  0x6f   : > { %2789 = sst [smem:[#allocation25_spill]] %s2821_s19  ;;  %s54_s28 = ssub.s32 %s2161_s21, %s2821_s19 }
  0x70   : > { %p51_p6 = scmp.ge.s32.totalorder %s2823_s13, 2  ;;  %p73_p8 = scmp.ne.s32.totalorder %s2145_s17, %s2141_s16 }
  0x71   : > { %p2433_p10 = por %p68_p0, %p67_p13  ;;  %s114_s27 = sadd.s32 1, %s2137_s15 }
  0x72   : > { %s2825_s13 = smov (%p51_p6, %s2823_s13), 0  ;;  %p2792_p12 = scmp.eq.s32.totalorder %s2300_s24, 0 }
  0x73   : > { %2791 = sst [smem:[#allocation26_spill]] %s2825_s13  ;;  %p337_p4 = scmp.eq.s32.totalorder %s2300_s24, 3 }
  0x74   : > { %p2445_p1 = por %p2792_p12, %p73_p8  ;;  %s53_s12 = ssub.s32 %s2165_s22, %s2825_s13 }
  0x75   : > { %p343_p7 = scmp.eq.s32.totalorder %s1555_s3, 3  ;;  %s55_s9 = sor.u32 %s54_s28, %s53_s12 }
  0x76   : > { %s2793_s7 = scalar_select %p2445_p1, 1, 0 }
  0x77   : > { %p112_p5 = scmp.eq.s32.totalorder %s53_s12, 0  ;;  %p58_p11 = scmp.eq.s32.totalorder %s55_s9, 0 }
  0x78   : > { %p2455_p2 = por %p337_p4, %p67_p13  ;;  %p2468_p3 = por %p343_p7, %p73_p8 }
  0x79   : > { %s2460_s25 = scalar_select %p112_p5, %s2137_s15, %s114_s27  }
  0x7a   : > { %s2794_s10 = scalar_select %p2455_p2, 1, 0 }
  0x7b   : > { %s2463_s8 = scalar_select %p58_p11, %s2149_s18, %s60_s2  }
  0x7c   : > { %s2796_s29 = scalar_select %p2468_p3, 1, 0 }
  0x7d   : > { %2795 = sst [smem:[#allocation27_spill]] %s2463_s8  ;;  %p1747_p9 = scmp.lt.s32.totalorder %s2169_s23, 4 }
  0x7e   : > { %s441_s14 = sand.u32 1, %s2149_s18   ;;  %s1565_s3 = sshll.u32 %s2165_s22, 1 }
  0x7f   : > { %s2475_s28 = sshll.u32 %s441_s14, 2  ;;  %s451_s12 = sadd.s32 %s2161_s21, %s1565_s3 }
  0x80   : > { %s1566_s9 = sshll.u32 %s451_s12, 6  ;;  %s445_s4 = scalar_lea.vmem [#allocation5], %s2475_s28 }
  0x81   : > { %s455_s6 = sshll.u32 %s445_s4, 4  ;;  %s2482_s2 = scalar_lea.hbm %s2740_s0, %s1566_s9  ;;  %s2484_s6 = int_to_ptr.vmem [resolvable:$true] %s455_s6 }
  0x82   : > { %p2488_p13 = pnand %p1747_p9, %p2433_p10  ;;  %s2495_s4 = scalar_lea.hbm %s2741_s1, %s1566_s9 }
  0x83   : > { %s462_s13 = sand.u32 1, %s2169_s23   ;;  %s442_s27 = scalar_lea.sflag [#allocation6], %s441_s14 }
  0x84   : > { %s1975_s22 = scalar_lea.hbm %s2482_s2, 64  ;;  %p1977_p6 = pneg %p2488_p13 }
  0x85   : > { %p1976_p0 = scmp.ne.s32.totalorder %s2482_s2, %s1975_s22  ;;  %s1980_s8 = scalar_lea.hbm %s2740_s0, 256 }
  0x86   : > { %p1981_p12 = scmp.lt.u32.totalorder %s2482_s2, %s2740_s0  ;;  %p1982_p4 = scmp.lt.u32.totalorder %s1980_s8, %s1975_s22 }
  0x87   : > { %p1978_p8 = pnand %p1977_p6, %p1976_p0  ;;  %p1984_p5 = scmp.lt.u32.totalorder %s1975_s22, %s2482_s2 }
  0x88   : > { %p1983_p7 = por %p1982_p4, %p1981_p12 }
  0x89   : > { %p1979_p10 = pneg %p1978_p8 }
  0x8a   : > { %p1985_p11 = por %p1984_p5, %p1983_p7 }
  0x8c   : > { %p1986_p9 = pnand %p1985_p11, %p1979_p10 }
  0x8e   : > { %1989 = shalt.err (!%p1986_p9)
}
  0x8f   : > { %s1990_s14 = scalar_lea.vmem %s2484_s6, 64  ;;  %s2176_s21 = smov [#allocation5]  }
  0x90   : > { %p1991_p0 = scmp.ne.s32.totalorder %s2484_s6, %s1990_s14  ;;  %s1995_s9 = sshll.u32 %s2176_s21, 4  ;;  %s1996_s9 = int_to_ptr.vmem [resolvable:$false] %s1995_s9 }
  0x91   : > { %s1997_s18 = scalar_lea.vmem %s1996_s9, 128  ;;  %p1998_p2 = scmp.lt.s32.totalorder %s2484_s6, %s1996_s9 }
  0x92   : > { %p1993_p8 = pnand %p1991_p0, %p1977_p6  ;;  %p1999_p12 = scmp.lt.s32.totalorder %s1997_s18, %s1990_s14 }
  0x94   : > { %p1994_p3 = pneg %p1993_p8  ;;  %p2000_p4 = por %p1999_p12, %p1998_p2 }
  0x96   : > { %p2001_p7 = pnand %p2000_p4, %p1994_p3 }
  0x98   : > { %2004 = shalt.err (!%p2001_p7)
}
  0x99   : > { %1739 = dma.hbm_to_vmem [thread:$0]  (!%p2488_p13), %s2482_s2, 64, %s2484_s6, %s442_s27  }
  0x9a   : > { %s466_s22 = scalar_lea.vmem [#allocation8], %s2475_s28  ;;  %s463_s12 = scalar_lea.sflag [#allocation9], %s462_s13 }
  0x9b   : > { %s475_s8 = sshll.u32 %s466_s22, 4  ;;  %s2005_s11 = scalar_lea.hbm %s2495_s4, 64  ;;  %s476_s8 = int_to_ptr.vmem [resolvable:$true] %s475_s8 }
  0x9c   : > { %p2006_p2 = scmp.ne.s32.totalorder %s2495_s4, %s2005_s11  ;;  %s2010_s21 = scalar_lea.hbm %s2741_s1, 256 }
  0x9d   : > { %p2011_p5 = scmp.lt.u32.totalorder %s2495_s4, %s2741_s1  ;;  %p2012_p11 = scmp.lt.u32.totalorder %s2010_s21, %s2005_s11 }
  0x9e   : > { %p2008_p3 = pnand %p2006_p2, %p1977_p6  ;;  %p2014_p0 = scmp.lt.u32.totalorder %s2005_s11, %s2495_s4 }
  0x9f   : > { %p2013_p9 = por %p2012_p11, %p2011_p5 }
  0xa0   : > { %p2009_p10 = pneg %p2008_p3 }
  0xa1   : > { %p2015_p8 = por %p2014_p0, %p2013_p9 }
  0xa3   : > { %p2016_p12 = pnand %p2015_p8, %p2009_p10 }
  0xa5   : > { %2019 = shalt.err (!%p2016_p12)
}
  0xa6   : > { %s2020_s6 = scalar_lea.vmem %s476_s8, 64  ;;  %s2177_s28 = smov [#allocation8]  }
  0xa7   : > { %p2021_p4 = scmp.ne.s32.totalorder %s476_s8, %s2020_s6  ;;  %s2025_s2 = sshll.u32 %s2177_s28, 4  ;;  %s2026_s2 = int_to_ptr.vmem [resolvable:$false] %s2025_s2 }
  0xa8   : > { %s2027_s13 = scalar_lea.vmem %s2026_s2, 128  ;;  %p2028_p3 = scmp.lt.s32.totalorder %s476_s8, %s2026_s2 }
  0xa9   : > { %p2023_p7 = pnand %p2021_p4, %p1977_p6  ;;  %p2029_p1 = scmp.lt.s32.totalorder %s2027_s13, %s2020_s6 }
  0xab   : > { %p2024_p2 = pneg %p2023_p7  ;;  %p2030_p5 = por %p2029_p1, %p2028_p3 }
  0xad   : > { %p2031_p11 = pnand %p2030_p5, %p2024_p2 }
  0xaf   : > { %2034 = shalt.err (!%p2031_p11)
}
  0xb0   : > { %1742 = dma.hbm_to_vmem [thread:$0]  (!%p2488_p13), %s2495_s4, 64, %s476_s8, %s463_s12  }
  0xb1   : > { %p2798_p10 = scmp.ne.s32.totalorder %s2781_s30, 0 }
  0xb2   : > { %s2548_s27 = sand.u32 (!%p2798_p10), 1, %s2145_s17   ;;  %p2799_p1 = scmp.ne.s32.totalorder (!%p2798_p10), %s2793_s7, 0 }
  0xb3   : > { %484 = sbr.rel (%p2798_p10) target bundleno = 1831 (0x727), region = 60  ;;  %s1571_s22 = sshll.u32 (!%p2798_p10), %s2548_s27, 2 }
  0xb4   : > { %s487_s11 = scalar_lea.sflag (!%p2798_p10), [#allocation6], %s2548_s27  ;;  %s2552_s3 = scalar_lea.vmem (!%p2798_p10), [#allocation5], %s1571_s22 }
  0xba   : > { %2108 = dma.done.wait (%p2799_p1), %s487_s11, 64  }
  0xbb   : > { %2110 = vsyncadd (%p2799_p1), %s487_s11, 4294967232  ;;  %s495_s19 = sand.u32 1, %s2300_s24   ;;  %s499_s4 = scalar_lea.vmem [#allocation8], %s1571_s22 }
  0xbc   : > { %s496_s30 = scalar_lea.sflag [#allocation9], %s495_s19 }
  0xbd   : > { %2112 = dma.done.wait (%p2799_p1), %s496_s30, 64  }
  0xbe   : > { %2114 = vsyncadd (%p2799_p1), %s496_s30, 4294967232  ;;  %p2800_p13 = scmp.ne.s32.totalorder %s2779_s26, 0 }
  0xc0   : > { %2116 = dma.done.wait (%p2800_p13), [#allocation9], 256  }
  0xc1   : > { %2118 = vsyncadd (%p2800_p13), [#allocation9], 4294967040 }
  0xc2   : > { %2120 = dma.done.wait (%p2800_p13), [#allocation12], 512  }
  0xc3   : > { %2122 = vsyncadd (%p2800_p13), [#allocation12], 4294966784  ;;  %v2178_v0 = vmov 0.0   ;;  %vm2179_vm0 = vmmov 0   ;;  %v1854_v1 = vld [vmem:[#allocation11] sm:$0xff]   ;;  %v1855_v2 = vld [vmem:[#allocation11 + $0x8] sm:$0xff]  }
  0xc4   : > { %1642 = vmatprep.subr.bf16.mxu0 %v2178_v0  ;;  %1650 = vmatprep.subr.bf16.mxu1 %v2178_v0  ;;  %v1856_v3 = vld [vmem:[#allocation10] sm:$0xff]   ;;  %v1857_v4 = vld [vmem:[#allocation10 + $0x8] sm:$0xff]   ;;  %v588_v5 = vld [vmem:[%s499_s4] sm:$0xf]  ;;  %vm612_vm1 = vcmask 261120   ;;  %p568_p6 = scmp.lt.s32.totalorder %s2157_s20, 1 }
  0xc5   : > { %1646 = vmatprep.mubr.msk.bf16.mxu0 %vm2179_vm0, %v2178_v0  ;;  %1654 = vmatprep.mubr.msk.bf16.mxu1 %vm2179_vm0, %v2178_v0  ;;  %v659_v6 = vld [vmem:[%s2552_s3] sm:$0xf]  ;;  %s2801_s21 = sld [smem:[#allocation29_spill]]  ;;  %vm657_vm2 = vcmask 519168   ;;  %vm728_vm3 = vcmask 257024   ;;  %vm732_vm4 = vcmask 64512  }
  0xc6   : > { %1643 = vmatpush3.bf16.msra.mxu0 %v1854_v1  ;;  %1651 = vmatpush3.bf16.msra.mxu1 %v1856_v3  ;;  %s2590_s24 = scalar_select %p568_p6, %s2157_s20, 1  ;;  %vm797_vm5 = vcmask 1043456   ;;  %vm844_vm6 = vcmask 60416   ;;  %vm971_vm7 = vcmask 126016   ;;  %vm1098_vm8 = vcmask 191616  }
  0xc7   : > { %1644 = vmatprep.subr.bf16.mxu0 %v2178_v0  ;;  %1652 = vmatprep.subr.bf16.mxu1 %v2178_v0  ;;  %s2180_s18 = smov 112   ;;  %s2181_s6 = smov 120   ;;  %vm1225_vm9 = vcmask 257216  }
  0xc8   : > { %s573_s8 = scalar_lea.vmem %s2745_s5, %s2590_s24  ;;  %s2182_s28 = smov 104  }
  0xc9   : > { %v1574_v7 = vld [vmem:[%s573_s8] ss:$0 sm:$0xff]  ;;  %s2183_s2 = smov 96   ;;  %s2184_s13 = smov 80  }
  0xca   : > { %1645 = vmatpush3.bf16.msra.mxu0 %v1855_v2  ;;  %1653 = vmatpush3.bf16.msra.mxu1 %v1857_v4  ;;  %s2185_s22 = smov 72   ;;  %s2186_s11 = smov 88  }
  0xcb   : > { %1658 = vmatprep.subr.bf16.mxu0 %v2178_v0  ;;  %1664 = vmatprep.subr.bf16.mxu1 %v2178_v0  ;;  %s570_s9 = scalar_lea.vmem %s2801_s21, %s2590_s24  ;;  %s2187_s19 = smov 8  }
  0xcc   : > { %v1578_v9 = vld [vmem:[%s570_s9] ss:$0 sm:$0xff]  ;;  %s2188_s30 = smov 16   ;;  %s2189_s4 = smov 24  }
  0xcd   : > { %1647 = vmatmul.mubr.msk.bf16.vlgmr.msra.gmra.mrb[0].mxu0 %vm612_vm1, %v588_v5  ;;  %1655 = vmatmul.mubr.msk.bf16.vlgmr.msra.gmra.mrb[0].mxu1 %vm612_vm1, %v659_v6  ;;  %s2802_s8 = sld [smem:[#allocation32_spill]]  ;;  %s2803_s14 = sld [smem:[#allocation22_spill]] }
  0xce   : > { %1660 = vmatprep.mubr.msk.bf16.mxu0 %vm2179_vm0, %v2178_v0  ;;  %1666 = vmatprep.mubr.msk.bf16.mxu1 %vm2179_vm0, %v2178_v0  ;;  %s1607_s21 = sshll.u32 %s2157_s20, 1  ;;  %p2807_p0 = scmp.ne.s32.totalorder %s2794_s10, 0 }
  0xd3   : > { %s576_s12 = scalar_lea.vmem %s2802_s8, %s2590_s24  ;;  %s2806_s8 = sld [smem:[#allocation35_spill]] }
 0x1a0   : > { %v650_v8 = vpop.f32.mrb[0].mxu0  ;;  %v721_v13 = vpop.f32.mrb[0].mxu1 }
 0x1a1   : > { %v651_v10 = vadd.f32 %v1574_v7, %v650_v8  ;;  %v1648_v11 = vpop.f32.mrb[1].mxu0  ;;  %v722_v16 = vadd.f32 %v1578_v9, %v721_v13  ;;  %v1656_v17 = vpop.f32.mrb[1].mxu1 }
 0x1a2   : > { %v653_v12 = vpop.f32.mrb[2].mxu0  ;;  %v724_v18 = vpop.f32.mrb[2].mxu1 }
 0x1a3   : > { %v656_v14 = vpack.c.bf16 %v651_v10, %v651_v10  ;;  %v1649_v15 = vpop.f32.mrb[3].mxu0  ;;  %v727_v19 = vpack.c.bf16 %v722_v16, %v722_v16  ;;  %v1657_v20 = vpop.f32.mrb[3].mxu1 }
 0x1a5   : > { %658 = vst.msk [vmem:[#allocation2] sm:$0xf] %vm657_vm2, %v656_v14 }
 0x1a6   : > { %729 = vst.msk [vmem:[#allocation3] sm:$0xf] %vm728_vm3, %v727_v19 }
 0x1ac   : > { %v731_v21 = vld [vmem:[#allocation2] sm:$0xf] }
 0x1ad   : > { %v2600_v22 = vld [vmem:[#allocation2] ss:$0 sps:$4 sm:$0xff]   ;;  %v737_v23 = vsel %vm732_vm4, %v731_v21, 0  ;;  %v1860_v25 = vld [vmem:[#allocation3] ss:$0 sps:$4 sm:$0xff]   ;;  %v1583_v30 = vcombine.low %v731_v21, %v731_v21 }
 0x1ae   : > { %v2603_v24 = vld [vmem:[#allocation2] ss:$0 sps:$4 sm:$0xff]   ;;  %1659 = vmatpush3.bf16.xpose.msra.mxu0 %v737_v23  ;;  %983 = vrot.lane.b32.xlu1 %v2600_v22, %s2180_s18  ;;  %v1861_v26 = vld [vmem:[#allocation3] ss:$0 sps:$4 sm:$0xff]  }
 0x1af   : > { %856 = vrot.lane.b32.xlu0 %v2603_v24, %s2181_s6  ;;  %1670 = vmatprep.subr.bf16.mxu0 %v2178_v0  ;;  %v730_v27 = vld [vmem:[#allocation3] sm:$0xf]  ;;  %v1863_v29 = vld [vmem:[#allocation2] ss:$0 sps:$4 sm:$0xff]  }
 0x1b0   : > { %v1862_v28 = vld [vmem:[#allocation3] ss:$0 sps:$4 sm:$0xff]  }
 0x1b2   : > { %978 = vrot.lane.b32.xlu1 %v1860_v25, %s2180_s18 }
 0x1b3   : > { %851 = vrot.lane.b32.xlu0 %v1861_v26, %s2181_s6  ;;  %s2804_s6 = sld [smem:[#allocation33_spill]] }
 0x1b5   : > { %1661 = vmatmul.mubr.msk.bf16.vlgmr.msra.gmra.mrb[4].mxu0 %vm732_vm4, %v730_v27 }
 0x1b6   : > { %1105 = vrot.lane.b32.xlu1 %v1862_v28, %s2182_s28  ;;  %1672 = vmatprep.mubr.msk.bf16.mxu0 %vm2179_vm0, %v2178_v0 }
 0x1b7   : > { %1110 = vrot.lane.b32.xlu0 %v1863_v29, %s2182_s28 }
 0x1b9   : > { %s579_s28 = scalar_lea.vmem %s2804_s6, %s2590_s24 }
 0x1ba   : > { %792 = vrot.lane.b32.xlu1 %v1583_v30, %s2183_s2 }
 0x220   : > { %v984_v31 = vpop.permute.xlu1 %983 }
 0x221   : > { %v857_v32 = vpop.permute.xlu0 %856  ;;  %v989_v37 = vsel %vm732_vm4, %v984_v31, 0 }
 0x222   : > { %v862_v33 = vsel %vm732_vm4, %v857_v32, 0 }
 0x223   : > { %1671 = vmatpush3.bf16.xpose.msra.mxu0 %v862_v33 }
 0x224   : > { %v979_v34 = vpop.permute.xlu1 %978  ;;  %1682 = vmatprep.subr.bf16.mxu0 %v2178_v0 }
 0x225   : > { %v852_v36 = vpop.permute.xlu0 %851 }
 0x228   : > { %v1106_v35 = vpop.permute.xlu1 %1105 }
 0x229   : > { %v1111_v40 = vpop.permute.xlu0 %1110 }
 0x22a   : > { %1673 = vmatmul.mubr.msk.bf16.vlgmr.msra.gmra.mrb[8].mxu0 %vm732_vm4, %v852_v36  ;;  %v1116_v41 = vsel %vm732_vm4, %v1111_v40, 0 }
 0x22b   : > { %1683 = vmatpush3.bf16.xpose.msra.mxu0 %v989_v37  ;;  %1684 = vmatprep.mubr.msk.bf16.mxu0 %vm2179_vm0, %v2178_v0 }
 0x22c   : > { %v793_v38 = vpop.permute.xlu1 %792  ;;  %1694 = vmatprep.subr.bf16.mxu0 %v2178_v0 }
 0x22d   : > { %v799_v39 = vsel %vm797_vm5, %v793_v38, 0 }
 0x22e   : > { %1665 = vmatpush3.bf16.msra.mxu1 %v799_v39 }
 0x22f   : > { %1676 = vmatprep.subr.bf16.mxu1 %v2178_v0 }
 0x232   : > { %1685 = vmatmul.mubr.msk.bf16.vlgmr.msra.gmra.mrb[12].mxu0 %vm732_vm4, %v979_v34 }
 0x233   : > { %1695 = vmatpush3.bf16.xpose.msra.mxu0 %v1116_v41  ;;  %1696 = vmatprep.mubr.msk.bf16.mxu0 %vm2179_vm0, %v2178_v0 }
 0x234   : > { %1706 = vmatprep.subr.bf16.mxu0 %v2178_v0 }
 0x23a   : > { %1697 = vmatmul.mubr.msk.bf16.vlgmr.msra.gmra.mrb[16].mxu0 %vm732_vm4, %v1106_v35 }
 0x23b   : > { %1710 = vmatprep.mubr.msk.bf16.mxu0 %vm2179_vm0, %v2178_v0 }
 0x288   : > { %v773_v42 = vpop.f32.mrb[4].mxu0 }
 0x289   : > { %v1662_v43 = vpop.f32.mrb[5].mxu0  ;;  %v779_v44 = vsel %vm732_vm4, %v773_v42, -inf }
 0x28a   : > { %780 = vmax.xlane.f32.xlu0 %v779_v44  ;;  %v776_v45 = vpop.f32.mrb[6].mxu0 }
 0x28b   : > { %v1663_v46 = vpop.f32.mrb[7].mxu0 }
 0x2fd   : > { %v898_v47 = vpop.f32.mrb[8].mxu0 }
 0x2fe   : > { %v1674_v48 = vpop.f32.mrb[9].mxu0  ;;  %v904_v49 = vsel %vm732_vm4, %v898_v47, -inf }
 0x2ff   : > { %905 = vmax.xlane.f32.xlu1 %v904_v49  ;;  %v901_v50 = vpop.f32.mrb[10].mxu0  ;;  %v1865_v49 = vld [vmem:[#allocation13] sm:$0xff]  }
 0x300   : > { %v1675_v51 = vpop.f32.mrb[11].mxu0  ;;  %1707 = vmatpush3.bf16.msra.mxu0 %v1865_v49 }
 0x301   : > { %1708 = vmatprep.subr.bf16.mxu0 %v2178_v0 }
 0x305   : > { %v1025_v52 = vpop.f32.mrb[12].mxu0 }
 0x306   : > { %v1686_v53 = vpop.f32.mrb[13].mxu0  ;;  %v1031_v54 = vsel %vm732_vm4, %v1025_v52, -inf }
 0x307   : > { %1032 = vmax.xlane.f32.xlu0 %v1031_v54  ;;  %v1028_v55 = vpop.f32.mrb[14].mxu0  ;;  %v1866_v53 = vld [vmem:[#allocation13 + $0x8] sm:$0xff]  }
 0x308   : > { %v1687_v56 = vpop.f32.mrb[15].mxu0  ;;  %1709 = vmatpush3.bf16.msra.mxu0 %v1866_v53 }
 0x30d   : > { %v1152_v57 = vpop.f32.mrb[16].mxu0 }
 0x30e   : > { %v1698_v58 = vpop.f32.mrb[17].mxu0  ;;  %v1158_v59 = vsel %vm732_vm4, %v1152_v57, -inf }
 0x30f   : > { %1159 = vmax.xlane.f32.xlu0 %v1158_v59  ;;  %v1155_v60 = vpop.f32.mrb[18].mxu0 }
 0x310   : > { %1041 = vrot.lane.b32.xlu1 %v2600_v22, %s2184_s13  ;;  %v1699_v61 = vpop.f32.mrb[19].mxu0 }
 0x314   : > { %1168 = vrot.lane.b32.xlu1 %v1863_v29, %s2185_s22  ;;  %s2805_s22 = sld [smem:[#allocation34_spill]] }
 0x317   : > { %v781_v62 = vpop.xlane.xlu0 %780 }
 0x318   : > { %v782_v63 = vsub.f32 %v773_v42, %v781_v62 }
 0x31a   : > { %v783_v1 = vmul.f32 1.442695, %v782_v63 }
 0x31c   : > { %1867 = vpow2.f32 %v783_v1 }
 0x325   : > { %914 = vrot.lane.b32.xlu0 %v2603_v24, %s2186_s11  ;;  %s582_s11 = scalar_lea.vmem %s2805_s22, %s2590_s24  ;;  %s1329_s24 = scalar_lea.sflag [#allocation7], %s2548_s27 }
 0x326   : > { %v1868_v2 = vpop.eup %1867 }
 0x327   : > { %v788_v3 = vpack.c.bf16 %v1868_v2, %v1868_v2  ;;  %v785_v27 = vsel %vm732_vm4, %v1868_v2, 0.0 }
 0x329   : > { %1667 = vmatmul.mubr.msk.bf16.vlgmr.msra.gmra.mrb[4].mxu1 %vm732_vm4, %v788_v3  ;;  %v1294_v3 = vld [vmem:[%s2552_s3] sm:$0xf]  ;;  %s1573_s3 = sshll.u32 %s2548_s27, 3 }
 0x32a   : > { %1678 = vmatprep.mubr.msk.bf16.mxu1 %vm2179_vm0, %v2178_v0 }
 0x38c   : > { %v906_v4 = vpop.xlane.xlu1 %905 }
 0x38d   : > { %v907_v5 = vsub.f32 %v898_v47, %v906_v4  ;;  %v1600_v4 = vld [vmem:[%s576_s12] ss:$0 sm:$0xff] }
 0x38f   : > { %v908_v6 = vmul.f32 1.442695, %v907_v5  ;;  %v1295_v5 = vunpack.c.l.bf16 %v1294_v3 }
 0x390   : > { %v1042_v17 = vpop.permute.xlu1 %1041 }
 0x391   : > { %1869 = vpow2.f32 %v908_v6  ;;  %v1047_v21 = vsel %vm797_vm5, %v1042_v17, 0 }
 0x394   : > { %v1033_v7 = vpop.xlane.xlu0 %1032  ;;  %v1169_v22 = vpop.permute.xlu1 %1168 }
 0x395   : > { %v1034_v8 = vsub.f32 %v1025_v52, %v1033_v7  ;;  %v1174_v26 = vsel %vm797_vm5, %v1169_v22, 0  ;;  %v1604_v22 = vld [vmem:[%s579_s28] ss:$0 sm:$0xff] }
 0x397   : > { %v1035_v9 = vmul.f32 1.442695, %v1034_v8 }
 0x399   : > { %1871 = vpow2.f32 %v1035_v9 }
 0x39b   : > { %v1870_v10 = vpop.eup %1869 }
 0x39c   : > { %v1160_v11 = vpop.xlane.xlu0 %1159  ;;  %v910_v12 = vsel %vm732_vm4, %v1870_v10, 0.0  ;;  %v913_v19 = vpack.c.bf16 %v1870_v10, %v1870_v10 }
 0x39d   : > { %v1161_v13 = vsub.f32 %v1152_v57, %v1160_v11  ;;  %911 = vadd.xlane.f32.xlu0 %v910_v12 }
 0x39f   : > { %v1162_v14 = vmul.f32 1.442695, %v1161_v13 }
 0x3a0   : > { %v915_v15 = vpop.permute.xlu0 %914 }
 0x3a1   : > { %1873 = vpow2.f32 %v1162_v14  ;;  %v920_v16 = vsel %vm797_vm5, %v915_v15, 0 }
 0x3a2   : > { %1677 = vmatpush3.bf16.msra.mxu1 %v920_v16 }
 0x3a3   : > { %v1872_v18 = vpop.eup %1871  ;;  %1688 = vmatprep.subr.bf16.mxu1 %v2178_v0 }
 0x3a4   : > { %v1037_v20 = vsel %vm732_vm4, %v1872_v18, 0.0  ;;  %v1040_v24 = vpack.c.bf16 %v1872_v18, %v1872_v18 }
 0x3a5   : > { %1038 = vadd.xlane.f32.xlu1 %v1037_v20  ;;  %1679 = vmatmul.mubr.msk.bf16.vlgmr.msra.gmra.mrb[8].mxu1 %vm732_vm4, %v913_v19 }
 0x3a6   : > { %1689 = vmatpush3.bf16.msra.mxu1 %v1047_v21  ;;  %1690 = vmatprep.mubr.msk.bf16.mxu1 %vm2179_vm0, %v2178_v0 }
 0x3a7   : > { %1700 = vmatprep.subr.bf16.mxu1 %v2178_v0 }
 0x3ab   : > { %v1874_v23 = vpop.eup %1873 }
 0x3ac   : > { %v1164_v25 = vsel %vm732_vm4, %v1874_v23, 0.0  ;;  %v1167_v28 = vpack.c.bf16 %v1874_v23, %v1874_v23 }
 0x3ad   : > { %1165 = vadd.xlane.f32.xlu0 %v1164_v25  ;;  %1691 = vmatmul.mubr.msk.bf16.vlgmr.msra.gmra.mrb[12].mxu1 %vm732_vm4, %v1040_v24  ;;  %v1605_v24 = vld [vmem:[%s582_s11] ss:$0 sm:$0xff] }
 0x3ae   : > { %1701 = vmatpush3.bf16.msra.mxu1 %v1174_v26  ;;  %1702 = vmatprep.mubr.msk.bf16.mxu1 %vm2179_vm0, %v2178_v0 }
 0x3b1   : > { %786 = vadd.xlane.f32.xlu0 %v785_v27 }
 0x3b5   : > { %1703 = vmatmul.mubr.msk.bf16.vlgmr.msra.gmra.mrb[16].mxu1 %vm732_vm4, %v1167_v28 }
 0x3fc   : > { %v835_v29 = vpop.f32.mrb[4].mxu1 }
 0x3fd   : > { %v1668_v30 = vpop.f32.mrb[5].mxu1 }
 0x3fe   : > { %v838_v31 = vpop.f32.mrb[6].mxu1 }
 0x3ff   : > { %v1669_v32 = vpop.f32.mrb[7].mxu1 }
 0x42a   : > { %v912_v33 = vpop.xlane.xlu0 %911 }
 0x432   : > { %v1039_v39 = vpop.xlane.xlu1 %1038 }
 0x43a   : > { %v1166_v34 = vpop.xlane.xlu0 %1165 }
 0x43e   : > { %v787_v35 = vpop.xlane.xlu0 %786 }
 0x43f   : > { %1875 = vrcp.f32 %v787_v35 }
 0x440   : > { %1877 = vrcp.f32 %v912_v33 }
 0x441   : > { %1879 = vrcp.f32 %v1039_v39 }
 0x442   : > { %1881 = vrcp.f32 %v1166_v34 }
 0x449   : > { %v1876_v36 = vpop.eup %1875 }
 0x44a   : > { %v842_v37 = vmul.f32 %v1876_v36, %v835_v29  ;;  %v1878_v40 = vpop.eup %1877 }
 0x44b   : > { %v1880_v47 = vpop.eup %1879 }
 0x44c   : > { %v843_v38 = vpack.c.bf16 %v842_v37, %v842_v37  ;;  %v1882_v56 = vpop.eup %1881 }
 0x44e   : > { %845 = vst.msk [vmem:[#allocation4] sm:$0xf] %vm844_vm6, %v843_v38 }
 0x478   : > { %v956_v41 = vpop.f32.mrb[8].mxu1 }
 0x479   : > { %v963_v42 = vmul.f32 %v1878_v40, %v956_v41  ;;  %v1680_v43 = vpop.f32.mrb[9].mxu1 }
 0x47a   : > { %v959_v44 = vpop.f32.mrb[10].mxu1 }
 0x47b   : > { %v1614_v45 = vpack.c.bf16 %v963_v42, %v963_v42  ;;  %v1681_v46 = vpop.f32.mrb[11].mxu1 }
 0x47d   : > { %968 = vrot.lane.b32.xlu1 %v1614_v45, %s2187_s19  ;;  %s1341_s19 = sadd.s32 %s2803_s14, %s1607_s21 }
 0x480   : > { %v1083_v48 = vpop.f32.mrb[12].mxu1 }
 0x481   : > { %v1090_v50 = vmul.f32 %v1880_v47, %v1083_v48  ;;  %v1692_v51 = vpop.f32.mrb[13].mxu1 }
 0x482   : > { %v1086_v52 = vpop.f32.mrb[14].mxu1 }
 0x483   : > { %v1615_v54 = vpack.c.bf16 %v1090_v50, %v1090_v50  ;;  %v1693_v55 = vpop.f32.mrb[15].mxu1 }
 0x485   : > { %1095 = vrot.lane.b32.xlu0 %v1615_v54, %s2188_s30  ;;  %s1608_s30 = sshll.u32 %s1341_s19, 7 }
 0x486   : > { %s2676_s12 = scalar_lea.hbm %s2806_s8, %s1608_s30 }
 0x488   : > { %v1210_v57 = vpop.f32.mrb[16].mxu1 }
 0x489   : > { %v1217_v58 = vmul.f32 %v1882_v56, %v1210_v57  ;;  %v1704_v59 = vpop.f32.mrb[17].mxu1 }
 0x48a   : > { %v1213_v60 = vpop.f32.mrb[18].mxu1 }
 0x48b   : > { %v1616_v61 = vpack.c.bf16 %v1217_v58, %v1217_v58  ;;  %v1705_v62 = vpop.f32.mrb[19].mxu1 }
 0x48d   : > { %1222 = vrot.lane.b32.xlu1 %v1616_v61, %s2189_s4  ;;  %s567_s4 = scalar_lea.vmem [#allocation14], %s1573_s3  ;;  %s2190_s3 = smov [#allocation14]  }
 0x48e   : > { %s1345_s26 = sshll.u32 %s567_s4, 4  ;;  %s2039_s21 = sshll.u32 %s2190_s3, 4  ;;  %s2678_s26 = int_to_ptr.vmem [resolvable:$true] %s1345_s26  ;;  %s2040_s21 = int_to_ptr.vmem [resolvable:$false] %s2039_s21 }
 0x48f   : > { %s2035_s14 = scalar_lea.vmem %s2678_s26, 128  ;;  %s2041_s9 = scalar_lea.vmem %s2040_s21, 256 }
 0x490   : > { %p2036_p9 = scmp.ne.s32.totalorder %s2678_s26, %s2035_s14  ;;  %p2042_p4 = scmp.lt.s32.totalorder %s2678_s26, %s2040_s21 }
 0x491   : > { %p2043_p7 = scmp.lt.s32.totalorder %s2041_s9, %s2035_s14 }
 0x492   : > { %p2037_p8 = pnand %p2036_p9, %p2807_p0 }
 0x493   : > { %p2044_p2 = por %p2043_p7, %p2042_p4 }
 0x494   : > { %p2038_p12 = pneg %p2037_p8 }
 0x496   : > { %p2045_p3 = pnand %p2044_p2, %p2038_p12 }
 0x4ef   : > { %v969_v63 = vpop.permute.xlu1 %968 }
 0x4f0   : > { %972 = vst.msk [vmem:[#allocation4] sm:$0xf] %vm971_vm7, %v969_v63 }
 0x4f7   : > { %v1096_v1 = vpop.permute.xlu0 %1095 }
 0x4f8   : > { %1099 = vst.msk [vmem:[#allocation4] sm:$0xf] %vm1098_vm8, %v1096_v1 }
 0x4ff   : > { %v1223_v0 = vpop.permute.xlu1 %1222 }
 0x500   : > { %1226 = vst.msk [vmem:[#allocation4] sm:$0xf] %vm1225_vm9, %v1223_v0 }
 0x507   : > { %v1227_v2 = vld [vmem:[#allocation4] sm:$0xf] }
 0x508   : > { %1711 = vmatmul.mubr.msk.bf16.vlgmr.msra.gmra.mrb[20].mxu0 %vm612_vm1, %v1227_v2 }
 0x5db   : > { %v1288_v6 = vpop.f32.mrb[20].mxu0 }
 0x5dc   : > { %v1289_v7 = vadd.f32 %v1600_v4, %v1288_v6  ;;  %v1712_v8 = vpop.f32.mrb[21].mxu0 }
 0x5dd   : > { %v1291_v9 = vpop.f32.mrb[22].mxu0 }
 0x5de   : > { %v1713_v10 = vpop.f32.mrb[23].mxu0  ;;  %v1296_v11 = vadd.f32 %v1295_v5, %v1289_v7 }
 0x5e0   : > { %v1297_v12 = vsel %vm612_vm1, %v1296_v11, 0.0 }
 0x5e1   : > { %1298 = vadd.xlane.f32.xlu1 %v1297_v12 }
 0x66e   : > { %v1299_v13 = vpop.xlane.xlu1 %1298 }
 0x66f   : > { %v1301_v14 = vmul.f32 0.03125, %v1299_v13 }
 0x671   : > { %v1302_v15 = vsub.f32 %v1296_v11, %v1301_v14 }
 0x673   : > { %v1303_v16 = vmul.f32 %v1302_v15, %v1302_v15 }
 0x675   : > { %v1304_v17 = vsel %vm612_vm1, %v1303_v16, 0.0 }
 0x676   : > { %1305 = vadd.xlane.f32.xlu0 %v1304_v17 }
 0x703   : > { %v1306_v18 = vpop.xlane.xlu0 %1305 }
 0x704   : > { %v1307_v19 = vmul.f32 0.03125, %v1306_v18 }
 0x706   : > { %v1308_v20 = vadd.f32 1e-12, %v1307_v19 }
 0x708   : > { %1883 = vrsqrt.f32 %v1308_v20 }
 0x712   : > { %v1884_v21 = vpop.eup %1883 }
 0x713   : > { %v1310_v23 = vmul.f32 %v1884_v21, %v1302_v15 }
 0x715   : > { %v1318_v25 = vmul.f32 %v1604_v22, %v1310_v23 }
 0x717   : > { %v1326_v26 = vadd.f32 %v1605_v24, %v1318_v25 }
 0x719   : > { %1327 = vst.msk [vmem:[%s567_s4] sm:$0xff] %vm612_vm1, %v1326_v26 }
 0x71a   : > { %2048 = shalt.err (!%p2045_p3)
}
 0x71b   : > { %s2049_s27 = scalar_lea.hbm %s2676_s12, 128  ;;  %s2053_s28 = scalar_lea.hbm %s2806_s8, 512 }
 0x71c   : > { %p2050_p5 = scmp.ne.s32.totalorder %s2676_s12, %s2049_s27  ;;  %p2054_p1 = scmp.lt.u32.totalorder %s2676_s12, %s2806_s8 }
 0x71d   : > { %p2055_p13 = scmp.lt.u32.totalorder %s2053_s28, %s2049_s27  ;;  %p2057_p9 = scmp.lt.u32.totalorder %s2049_s27, %s2676_s12 }
 0x71e   : > { %p2051_p11 = pnand %p2050_p5, %p2807_p0 }
 0x71f   : > { %p2056_p6 = por %p2055_p13, %p2054_p1 }
 0x720   : > { %p2052_p10 = pneg %p2051_p11 }
 0x721   : > { %p2058_p8 = por %p2057_p9, %p2056_p6 }
 0x723   : > { %p2059_p12 = pnand %p2058_p8, %p2052_p10 }
 0x725   : > { %2062 = shalt.err (!%p2059_p12)
}
 0x726   : > { %1724 = dma.vmem_to_hbm [thread:$0]  (%p2807_p0), %s2678_s26, 128, %s2676_s12, %s1329_s24  }
 0x727 PF: > { %p1748_p4 = scmp.ge.s32.totalorder %s2169_s23, 2  ;;  %s1357_s22 = sand.u32 1, %s2141_s16  }
 0x728   : > { %p2808_p7 = scmp.ne.s32.totalorder %s2796_s29, 0  ;;  %s1358_s11 = scalar_lea.sflag [#allocation7], %s1357_s22 }
 0x72a   : > { %p1744_p2 = pnand %p1748_p4, %p2808_p7 }
 0x72c   : > { %2124 = dma.done.wait (!%p1744_p2), %s1358_s11, 128  }
 0x72d   : > { %2126 = vsyncadd (!%p1744_p2), %s1358_s11, 4294967168  ;;  %s30_s23 = sadd.s32 1, %s2169_s23   ;;  %s2809_s13 = sld [smem:[#allocation20_spill]] }
 0x72e   : > { %p27_p3 = scmp.ge.s32.totalorder %s30_s23, 6   ;;  %s2810_s10 = sld [smem:[#allocation21_spill]] }
 0x72f   : > { %s2811_s18 = sld [smem:[#allocation27_spill]]  ;;  %s2812_s19 = sld [smem:[#allocation23_spill]] }
 0x730   : > { %s2813_s20 = sld [smem:[#allocation24_spill]]  ;;  %s2814_s21 = sld [smem:[#allocation25_spill]] }
 0x731   : > { %s2815_s22 = sld [smem:[#allocation26_spill]]  ;;  %s2816_s14 = smov %s2137_s15 }
 0x732   : > { %s2817_s15 = smov %s2460_s25  ;;  %s2818_s16 = smov %s2145_s17 }
 0x733   :  { %29 = sbr.rel (!%p27_p3) target bundleno = 21 (0x15), region = 152 }
 0x734   : > { %s2819_s17 = smov %s2810_s10 }
 0x73a   :  { %1363 = vsyncpa [#allocation6], 1 }
 0x73b   :  { %1365 = vsyncpa [#allocation6 + $0x1], 1 }
 0x73c   :  { %1366 = vsyncpa [#allocation9], 1 }
 0x73d   :  { %1368 = vsyncpa [#allocation9 + $0x1], 1 }
 0x73e   :  { %1369 = vsyncpa [#allocation12], 1 }
 0x73f   :  { %1370 = vsyncpa [#allocation7], 1 }
 0x740   :  { %1372 = vsyncpa [#allocation7 + $0x1], 1 }

// kernel: tpu_custom_call.1
= control target key start
LH: loop header
LB: loop body
LE: loop exit
PB: predicated region body
PF: predicated region fallthrough
CT: control target
= control target key end

     0   :  { %s2866_s0 = inlined_call_operand.hbm [shape: bf16[2,2,8,32], index: 0, kind: input, shape index: {}]   ;;  %s2867_s1 = inlined_call_operand.hbm [shape: bf16[2,2,8,32], index: 1, kind: input, shape index: {}]   ;;  %s2868_s2 = inlined_call_operand.hbm [shape: bf16[2,32,32], index: 2, kind: input, shape index: {}]   ;;  %s2869_s3 = inlined_call_operand.vmem [shape: f32[2,1,32], index: 3, kind: input, shape index: {}]   ;;  %s2870_s4 = inlined_call_operand.hbm [shape: bf16[2,32,64], index: 4, kind: input, shape index: {}]   ;;  %s2871_s5 = inlined_call_operand.vmem [shape: f32[2,1,64], index: 5, kind: input, shape index: {}]   ;;  %s2872_s6 = inlined_call_operand.hbm [shape: bf16[2,32,32], index: 6, kind: input, shape index: {}]   ;;  %s2873_s7 = inlined_call_operand.vmem [shape: f32[2,1,32], index: 7, kind: input, shape index: {}]   ;;  %s2874_s8 = inlined_call_operand.vmem [shape: f32[2,1,32], index: 8, kind: input, shape index: {}]   ;;  %s2875_s9 = inlined_call_operand.vmem [shape: f32[2,1,32], index: 9, kind: input, shape index: {}]   ;;  %s2876_s10 = inlined_call_operand.hbm [shape: f32[2,2,8,32], index: 10, kind: output, shape index: {}]  }
   0x1   :  { %2904 = sst [smem:[#allocation34_spill]] %s2867_s1 }
   0x2   :  { %2905 = sst [smem:[#allocation35_spill]] %s2869_s3 }
   0x3   :  { %2906 = sst [smem:[#allocation36_spill]] %s2870_s4 }
   0x4   :  { %2907 = sst [smem:[#allocation37_spill]] %s2871_s5 }
   0x5   :  { %2908 = sst [smem:[#allocation38_spill]] %s2873_s7 }
   0x6   :  { %2909 = sst [smem:[#allocation39_spill]] %s2874_s8 }
   0x7   :  { %2910 = sst [smem:[#allocation40_spill]] %s2875_s9 }
   0x8   :  { %2911 = sst [smem:[#allocation41_spill]] %s2876_s10 }
   0x9   :  { %15 = vsyncpa [#allocation6], 0 }
   0xa   :  { %17 = vsyncpa [#allocation6 + $0x1], 0 }
   0xb   :  { %18 = vsyncpa [#allocation9], 0 }
   0xc   :  { %20 = vsyncpa [#allocation9 + $0x1], 0 }
   0xd   :  { %21 = vsyncpa [#allocation12], 0 }
   0xe   :  { %23 = vsyncpa [#allocation12 + $0x1], 0 }
   0xf   :  { %24 = vsyncpa [#allocation7], 0 }
  0x10   :  { %26 = vsyncpa [#allocation7 + $0x1], 0  ;;  %s2309_s13 = smov 0   ;;  %s2311_s14 = smov 0  }
  0x11   :  { %s2313_s15 = smov 0   ;;  %s2315_s16 = smov 0  }
  0x12   :  { %s2317_s17 = smov 0   ;;  %s2319_s18 = smov 0  }
  0x13   :  { %s2321_s19 = smov 0   ;;  %s2323_s20 = smov 0  }
  0x14   :  { %s2325_s21 = smov 0   ;;  %s2327_s22 = smov 0  }
  0x15   :  { %s2329_s23 = smov 0  }
  0x16 LB: > { %2912 = sst [smem:[#allocation20_spill]] %s2200_s15  ;;  %s2365_s24 = sadd.s32 4294967295, %s2232_s23   ;;  %s2232_s23 = sphi %s2329_s23, %s32_s23   ;;  %s2228_s22 = sphi %s2327_s22, %s2970_s22   ;;  %s2224_s21 = sphi %s2325_s21, %s2976_s21   ;;  %s2220_s20 = sphi %s2323_s20, %s2968_s20   ;;  %s2216_s19 = sphi %s2321_s19, %s2967_s19   ;;  %s2212_s18 = sphi %s2319_s18, %s2975_s18   ;;  %s2208_s17 = sphi %s2317_s17, %s2974_s17   ;;  %s2204_s16 = sphi %s2315_s16, %s2973_s16   ;;  %s2200_s15 = sphi %s2313_s15, %s2965_s15   ;;  %s2196_s14 = sphi %s2311_s14, %s2972_s14   ;;  %s2192_s13 = sphi %s2309_s13, %s2971_s13  }
  0x17   : > { %2913 = sst [smem:[#allocation21_spill]] %s2204_s16  ;;  %s1616_s25 = sadd.s32 4294967294, %s2232_s23  }
  0x18   : > { %2914 = sst [smem:[#allocation22_spill]] %s2216_s19  ;;  %s47_s26 = sadd.s32 1, %s2224_s21 }
  0x19   : > { %2915 = sst [smem:[#allocation23_spill]] %s2220_s20  ;;  %s51_s27 = sadd.s32 1, %s2228_s22 }
  0x1a   : > { %2916 = sst [smem:[#allocation24_spill]] %s2224_s21  ;;  %p49_p0 = scmp.ge.s32.totalorder %s47_s26, 2 }
  0x1b   : > { %2917 = sst [smem:[#allocation25_spill]] %s2228_s22  ;;  %s62_s28 = sadd.s32 1, %s2212_s18 }
  0x1c   : > { %2918 = sst [smem:[#allocation26_spill]] %s2232_s23  ;;  %p69_p1 = scmp.ne.s32.totalorder %s2212_s18, %s2208_s17 }
  0x1d   : > { %p70_p2 = scmp.eq.s32.totalorder %s2232_s23, 0  ;;  %s2978_s26 = smov (%p49_p0, %s47_s26), 0 }
  0x1e   : > { %2919 = sst [smem:[#allocation27_spill]] %s2978_s26  ;;  %s2980_s27 = smov (!%p49_p0, %s51_s27), %s2228_s22 }
  0x1f   : > { %s56_s29 = ssub.s32 %s2224_s21, %s2978_s26  ;;  %p2384_p3 = por %p70_p2, %p69_p1 }
  0x20   : > { %p53_p4 = scmp.ge.s32.totalorder %s2980_s27, 2  ;;  %p2880_p5 = scmp.ne.s32.totalorder %s2208_s17, %s2204_s16 }
  0x21   : > { %p76_p6 = scmp.eq.s32.totalorder %s2365_s24, 0  ;;  %s116_s11 = sadd.s32 1, %s2200_s15 }
  0x22   : > { %s2982_s27 = smov (%p53_p4, %s2980_s27), 0  ;;  %p123_p8 = scmp.ne.s32.totalorder %s2200_s15, %s2196_s14 }
  0x23   : > { %2921 = sst [smem:[#allocation28_spill]] %s2982_s27  ;;  %p2399_p7 = por %p76_p6, %p2880_p5 }
  0x24   : > { %s55_s26 = ssub.s32 %s2228_s22, %s2982_s27  ;;  %p129_p9 = scmp.ne.s32.totalorder %s2196_s14, %s2192_s13 }
  0x25   : > { %s2922_s12 = scalar_select %p2399_p7, 1, 0 }
  0x26   : > { %s57_s10 = sor.u32 %s56_s29, %s55_s26  ;;  %p114_p10 = scmp.eq.s32.totalorder %s55_s26, 0 }
  0x27   : > { %p60_p11 = scmp.eq.s32.totalorder %s57_s10, 0  ;;  %p2411_p12 = por %p123_p8, %p70_p2 }
  0x28   : > { %s2416_s8 = scalar_select %p114_p10, %s2200_s15, %s116_s11  }
  0x29   : > { %s2419_s19 = scalar_select %p60_p11, %s2212_s18, %s62_s28  }
  0x2a   : > { %2924 = sst [smem:[#allocation29_spill]] %s2416_s8  ;;  %p2423_p13 = por %p129_p9, %p76_p6 }
  0x2b   : > { %2925 = sst [smem:[#allocation30_spill]] %s2419_s19  ;;  %p339_p0 = scmp.eq.s32.totalorder %s2365_s24, 3 }
  0x2c   : > { %s2926_s27 = scalar_select %p2423_p13, 1, 0 }
  0x2d   : > { %p345_p4 = scmp.eq.s32.totalorder %s1616_s25, 3  ;;  %p2431_p5 = por %p339_p0, %p69_p1 }
  0x2e   : > { %2927 = sst [smem:[#allocation31_spill]] %s2926_s27  ;;  %p1813_p2 = scmp.lt.s32.totalorder %s2232_s23, 4 }
  0x2f   : > { %s2928_s10 = scalar_select %p2431_p5, 1, 0 }
  0x30   : > { %p2930_p8 = scmp.ne.s32.totalorder %s2208_s17, %s2204_s16  ;;  %s2883_s26 = sand.u32 1, %s2212_s18  }
  0x31   : > { %2929 = sst [smem:[#allocation32_spill]] %s2928_s10  ;;  %s2446_s28 = sshll.u32 %s2883_s26, 2 }
  0x32   : > { %p2439_p10 = por %p345_p4, %p2930_p8  ;;  %s1620_s29 = sshll.u32 %s2228_s22, 1 }
  0x33   : > { %s2450_s11 = sadd.s32 %s2224_s21, %s1620_s29  ;;  %p2454_p1 = pnand %p1813_p2, %p2384_p3 }
  0x34   : > { %s2931_s13 = scalar_select %p2439_p10, 1, 0 }
  0x35   : > { %s2933_s25 = scalar_select %p2454_p1, 1, 0 }
  0x36   : > { %2932 = sst [smem:[#allocation33_spill]] %s2931_s13  ;;  %s2887_s19 = sshll.u32 %s2450_s11, 6 }
  0x37   : > { %s2889_s8 = sand.u32 1, %s2232_s23   ;;  %s2934_s1 = sld [smem:[#allocation34_spill]] }
  0x38   : > { %s390_s30 = scalar_lea.vmem [#allocation8], %s2446_s28  ;;  %p2470_p3 = pnand %p1813_p2, %p2411_p12 }
  0x39   : > { %s399_s29 = sshll.u32 %s390_s30, 4  ;;  %s2478_s10 = scalar_lea.sflag [#allocation9], %s2889_s8  ;;  %s2474_s29 = int_to_ptr.vmem [resolvable:$true] %s399_s29 }
  0x3a   : > { %s2935_s21 = scalar_select %p2470_p3, 1, 0 }
  0x3b   : > { %p2894_p9 = pneg %p2454_p1 }
  0x3d   : > { %s2465_s26 = scalar_lea.hbm %s2934_s1, %s2887_s19  ;;  %s1953_s9 = scalar_lea.hbm %s2934_s1, 256 }
  0x3e   : > { %s1948_s7 = scalar_lea.hbm %s2465_s26, 64  ;;  %p1954_p12 = scmp.lt.u32.totalorder %s2465_s26, %s2934_s1 }
  0x3f   : > { %p1949_p6 = scmp.ne.s32.totalorder %s2465_s26, %s1948_s7  ;;  %p1955_p4 = scmp.lt.u32.totalorder %s1953_s9, %s1948_s7 }
  0x40   : > { %p1957_p8 = scmp.lt.u32.totalorder %s1948_s7, %s2465_s26 }
  0x41   : > { %p1951_p11 = pnand %p2894_p9, %p1949_p6  ;;  %p1956_p2 = por %p1955_p4, %p1954_p12 }
  0x43   : > { %p1952_p0 = pneg %p1951_p11  ;;  %p1958_p10 = por %p1957_p8, %p1956_p2 }
  0x45   : > { %p1959_p5 = pnand %p1958_p10, %p1952_p0 }
  0x47   : > { %1962 = shalt.err (!%p1959_p5)
}
  0x48   : > { %s1963_s8 = scalar_lea.vmem %s2474_s29, 64  ;;  %s2234_s16 = smov [#allocation8]  }
  0x49   : > { %p1964_p6 = scmp.ne.s32.totalorder %s2474_s29, %s1963_s8  ;;  %s1968_s13 = sshll.u32 %s2234_s16, 4  ;;  %s1969_s13 = int_to_ptr.vmem [resolvable:$false] %s1968_s13 }
  0x4a   : > { %s1970_s19 = scalar_lea.vmem %s1969_s13, 128  ;;  %p1971_p7 = scmp.lt.s32.totalorder %s2474_s29, %s1969_s13 }
  0x4b   : > { %p1966_p11 = pnand %p1964_p6, %p2894_p9  ;;  %p1972_p12 = scmp.lt.s32.totalorder %s1970_s19, %s1963_s8 }
  0x4d   : > { %p1967_p13 = pneg %p1966_p11  ;;  %p1973_p4 = por %p1972_p12, %p1971_p7 }
  0x4f   : > { %p1974_p2 = pnand %p1973_p4, %p1967_p13 }
  0x51   : > { %1977 = shalt.err (!%p1974_p2)
}
  0x52   : > { %1799 = dma.hbm_to_vmem [thread:$0]  (!%p2454_p1), %s2465_s26, 64, %s2474_s29, %s2478_s10  }
  0x53   : > { %p1634_p5 = scmp.ge.s32.totalorder %s2232_s23, 1  ;;  %p497_p10 = scmp.lt.s32.totalorder %s2232_s23, 5 }
  0x54   : > { %s408_s7 = sand.u32 1, %s2200_s15   ;;  %s2512_s8 = sshll.u32 %s2228_s22, 8 }
  0x55   : > { %s2509_s9 = sshll.u32 %s408_s7, 4  ;;  %p2514_p7 = pnand %p1634_p5, %p497_p10 }
  0x56   : > { %s2937_s4 = sld [smem:[#allocation36_spill]]  ;;  %s437_s26 = scalar_lea.vmem [#allocation11], %s2509_s9 }
  0x57   : > { %s2936_s30 = scalar_select %p2514_p7, 1, 0 }
  0x58   : > { %s444_s29 = sshll.u32 %s437_s26, 4  ;;  %s2938_s7 = sand.u32 1, %s2232_s23   ;;  %s2525_s29 = int_to_ptr.vmem [resolvable:$true] %s444_s29 }
  0x59   : > { %s2529_s1 = scalar_lea.sflag [#allocation12], %s2938_s7  ;;  %p2535_p0 = pneg %p2470_p3 }
  0x5c   : > { %s2522_s19 = scalar_lea.hbm %s2937_s4, %s2512_s8  ;;  %s1983_s26 = scalar_lea.hbm %s2937_s4, 512 }
  0x5d   : > { %s1978_s22 = scalar_lea.hbm %s2522_s19, 256  ;;  %p1984_p11 = scmp.lt.u32.totalorder %s2522_s19, %s2937_s4 }
  0x5e   : > { %p1979_p13 = scmp.ne.s32.totalorder %s2522_s19, %s1978_s22  ;;  %p1985_p12 = scmp.lt.u32.totalorder %s1983_s26, %s1978_s22 }
  0x5f   : > { %p1987_p2 = scmp.lt.u32.totalorder %s1978_s22, %s2522_s19 }
  0x60   : > { %p1981_p8 = pnand %p2535_p0, %p1979_p13  ;;  %p1986_p4 = por %p1985_p12, %p1984_p11 }
  0x62   : > { %p1982_p6 = pneg %p1981_p8  ;;  %p1988_p5 = por %p1987_p2, %p1986_p4 }
  0x64   : > { %p1989_p10 = pnand %p1988_p5, %p1982_p6 }
  0x66   : > { %1992 = shalt.err (!%p1989_p10)
}
  0x67   : > { %s1993_s7 = scalar_lea.vmem %s2525_s29, 256  ;;  %s2235_s16 = smov [#allocation11]  }
  0x68   : > { %p1994_p13 = scmp.ne.s32.totalorder %s2525_s29, %s1993_s7  ;;  %s1998_s13 = sshll.u32 %s2235_s16, 4  ;;  %s1999_s13 = int_to_ptr.vmem [resolvable:$false] %s1998_s13 }
  0x69   : > { %s2000_s3 = scalar_lea.vmem %s1999_s13, 512  ;;  %p2001_p7 = scmp.lt.s32.totalorder %s2525_s29, %s1999_s13 }
  0x6a   : > { %p1996_p8 = pnand %p1994_p13, %p2535_p0  ;;  %p2002_p1 = scmp.lt.s32.totalorder %s2000_s3, %s1993_s7 }
  0x6c   : > { %p1997_p9 = pneg %p1996_p8  ;;  %p2003_p11 = por %p2002_p1, %p2001_p7 }
  0x6e   : > { %p2004_p12 = pnand %p2003_p11, %p1997_p9 }
  0x70   : > { %2007 = shalt.err (!%p2004_p12)
}
  0x71   : > { %s2236_s5 = smov 64   ;;  %s2237_s22 = smov 4  }
  0x72   : > { %1805 = dma.hbm_to_vmem [thread:$0]  (!%p2470_p3), %s2522_s19, 256, %s2525_s29, %s2529_s1, %s2236_s5, %s2236_s5, %s2237_s22  }
  0x73   : > { %s2940_s26 = sshll.u32 %s2450_s11, 6  ;;  %s369_s3 = scalar_lea.vmem [#allocation5], %s2446_s28 }
  0x74   : > { %s2567_s13 = scalar_lea.hbm %s2866_s0, %s2940_s26  ;;  %s379_s4 = sshll.u32 %s369_s3, 4  ;;  %s2570_s4 = int_to_ptr.vmem [resolvable:$true] %s379_s4 }
  0x75   : > { %s2576_s27 = scalar_lea.hbm %s2868_s2, %s2512_s8  ;;  %s2941_s19 = sand.u32 1, %s2212_s18  }
  0x76   : > { %s366_s11 = scalar_lea.sflag [#allocation6], %s2941_s19  ;;  %s2008_s29 = scalar_lea.hbm %s2567_s13, 64 }
  0x77   : > { %p2009_p1 = scmp.ne.s32.totalorder %s2567_s13, %s2008_s29  ;;  %p2942_p9 = scmp.ne.s32.totalorder %s2933_s25, 0 }
  0x78   : > { %s2013_s28 = scalar_lea.hbm %s2866_s0, 256  ;;  %p2014_p2 = scmp.lt.u32.totalorder %s2567_s13, %s2866_s0 }
  0x79   : > { %p2943_p7 = pneg %p2942_p9  ;;  %p2015_p5 = scmp.lt.u32.totalorder %s2013_s28, %s2008_s29 }
  0x7a   : > { %p2017_p13 = scmp.lt.u32.totalorder %s2008_s29, %s2567_s13 }
  0x7b   : > { %p2011_p6 = pnand %p2009_p1, %p2943_p7  ;;  %p2016_p10 = por %p2015_p5, %p2014_p2 }
  0x7d   : > { %p2012_p4 = pneg %p2011_p6  ;;  %p2018_p8 = por %p2017_p13, %p2016_p10 }
  0x7f   : > { %p2019_p11 = pnand %p2018_p8, %p2012_p4 }
  0x81   : > { %2022 = shalt.err (!%p2019_p11)
}
  0x82   : > { %s2023_s20 = scalar_lea.vmem %s2570_s4, 64  ;;  %p2944_p1 = pmov %p2943_p7 }
  0x83   : > { %p2024_p12 = scmp.ne.s32.totalorder %s2570_s4, %s2023_s20  ;;  %s2238_s23 = smov [#allocation5]  }
  0x84   : > { %s2028_s19 = sshll.u32 %s2238_s23, 4  ;;  %s2029_s19 = int_to_ptr.vmem [resolvable:$false] %s2028_s19 }
  0x85   : > { %p2026_p7 = pnand %p2024_p12, %p2944_p1  ;;  %s2030_s26 = scalar_lea.vmem %s2029_s19, 128 }
  0x86   : > { %p2031_p3 = scmp.lt.s32.totalorder %s2570_s4, %s2029_s19  ;;  %p2032_p2 = scmp.lt.s32.totalorder %s2030_s26, %s2023_s20 }
  0x87   : > { %p2027_p6 = pneg %p2026_p7 }
  0x88   : > { %p2033_p5 = por %p2032_p2, %p2031_p3 }
  0x8a   : > { %p2034_p10 = pnand %p2033_p5, %p2027_p6 }
  0x8c   : > { %2037 = shalt.err (!%p2034_p10)
}
  0x8d   : > { %1796 = dma.hbm_to_vmem [thread:$0]  (!%p2942_p9), %s2567_s13, 64, %s2570_s4, %s366_s11  }
  0x8e   : > { %s410_s29 = scalar_lea.vmem [#allocation10], %s2509_s9  ;;  %s2610_s3 = scalar_lea.hbm %s2872_s6, %s2512_s8 }
  0x8f   : > { %s417_s7 = sshll.u32 %s410_s29, 4  ;;  %s2038_s25 = scalar_lea.hbm %s2576_s27, 256  ;;  %s2604_s7 = int_to_ptr.vmem [resolvable:$true] %s417_s7 }
  0x90   : > { %p2039_p3 = scmp.ne.s32.totalorder %s2576_s27, %s2038_s25  ;;  %s2043_s19 = scalar_lea.hbm %s2868_s2, 512 }
  0x91   : > { %p2044_p9 = scmp.lt.u32.totalorder %s2576_s27, %s2868_s2  ;;  %p2045_p8 = scmp.lt.u32.totalorder %s2043_s19, %s2038_s25 }
  0x92   : > { %p2041_p4 = pnand %p2039_p3, %p2535_p0  ;;  %p2047_p12 = scmp.lt.u32.totalorder %s2038_s25, %s2576_s27 }
  0x93   : > { %p2046_p11 = por %p2045_p8, %p2044_p9 }
  0x94   : > { %p2042_p13 = pneg %p2041_p4 }
  0x95   : > { %p2048_p1 = por %p2047_p12, %p2046_p11 }
  0x97   : > { %p2049_p7 = pnand %p2048_p1, %p2042_p13 }
  0x99   : > { %2052 = shalt.err (!%p2049_p7)
}
  0x9a   : > { %s2053_s8 = scalar_lea.vmem %s2604_s7, 256  ;;  %s2239_s13 = smov [#allocation10]  }
  0x9b   : > { %p2054_p6 = scmp.ne.s32.totalorder %s2604_s7, %s2053_s8  ;;  %s2058_s11 = sshll.u32 %s2239_s13, 4  ;;  %s2059_s11 = int_to_ptr.vmem [resolvable:$false] %s2058_s11 }
  0x9c   : > { %s2060_s29 = scalar_lea.vmem %s2059_s11, 512  ;;  %p2061_p10 = scmp.lt.s32.totalorder %s2604_s7, %s2059_s11 }
  0x9d   : > { %p2056_p2 = pnand %p2054_p6, %p2535_p0  ;;  %p2062_p3 = scmp.lt.s32.totalorder %s2060_s29, %s2053_s8 }
  0x9f   : > { %p2057_p5 = pneg %p2056_p2  ;;  %p2063_p4 = por %p2062_p3, %p2061_p10 }
  0xa1   : > { %p2064_p9 = pnand %p2063_p4, %p2057_p5 }
  0xa3   : > { %2067 = shalt.err (!%p2064_p9)
}
  0xa4   : > { %p2945_p13 = scmp.ne.s32.totalorder %s2935_s21, 0  ;;  %s464_s28 = scalar_lea.vmem [#allocation13], %s2509_s9 }
  0xa5   : > { %s471_s16 = sshll.u32 %s464_s28, 4  ;;  %s2068_s25 = scalar_lea.hbm %s2610_s3, 256  ;;  %s2638_s16 = int_to_ptr.vmem [resolvable:$true] %s471_s16 }
  0xa6   : > { %1802 = dma.hbm_to_vmem [thread:$0]  (!%p2945_p13), %s2576_s27, 256, %s2604_s7, %s2478_s10, %s2236_s5, %s2236_s5, %s2237_s22  }
  0xa7   : > { %p2069_p8 = scmp.ne.s32.totalorder %s2610_s3, %s2068_s25  ;;  %s2073_s19 = scalar_lea.hbm %s2872_s6, 512 }
  0xa8   : > { %p2074_p1 = scmp.lt.u32.totalorder %s2610_s3, %s2872_s6  ;;  %p2075_p7 = scmp.lt.u32.totalorder %s2073_s19, %s2068_s25 }
  0xa9   : > { %p2071_p11 = pnand %p2069_p8, %p2535_p0  ;;  %p2077_p2 = scmp.lt.u32.totalorder %s2068_s25, %s2610_s3 }
  0xaa   : > { %p2076_p6 = por %p2075_p7, %p2074_p1 }
  0xab   : > { %p2072_p12 = pneg %p2071_p11 }
  0xac   : > { %p2078_p5 = por %p2077_p2, %p2076_p6 }
  0xae   : > { %p2079_p10 = pnand %p2078_p5, %p2072_p12 }
  0xb0   : > { %2082 = shalt.err (!%p2079_p10)
}
  0xb1   : > { %s2083_s27 = scalar_lea.vmem %s2638_s16, 256  ;;  %s2240_s10 = smov [#allocation13]  }
  0xb2   : > { %p2084_p3 = scmp.ne.s32.totalorder %s2638_s16, %s2083_s27  ;;  %s2088_s9 = sshll.u32 %s2240_s10, 4  ;;  %s2089_s9 = int_to_ptr.vmem [resolvable:$false] %s2088_s9 }
  0xb3   : > { %s2090_s7 = scalar_lea.vmem %s2089_s9, 512  ;;  %p2091_p8 = scmp.lt.s32.totalorder %s2638_s16, %s2089_s9 }
  0xb4   : > { %p2086_p4 = pnand %p2084_p3, %p2535_p0  ;;  %p2092_p11 = scmp.lt.s32.totalorder %s2090_s7, %s2083_s27 }
  0xb6   : > { %p2087_p9 = pneg %p2086_p4  ;;  %p2093_p1 = por %p2092_p11, %p2091_p8 }
  0xb8   : > { %p2094_p7 = pnand %p2093_p1, %p2087_p9 }
  0xba   : > { %2097 = shalt.err (!%p2094_p7)
}
  0xbb   : > { %1808 = dma.hbm_to_vmem [thread:$0]  (!%p2945_p13), %s2610_s3, 256, %s2638_s16, %s2529_s1, %s2236_s5, %s2236_s5, %s2237_s22  }
  0xbc   : > { %p2946_p0 = scmp.ne.s32.totalorder %s2936_s30, 0 }
  0xbd   : > { %s2668_s15 = sand.u32 (!%p2946_p0), 1, %s2208_s17   ;;  %p2947_p12 = scmp.ne.s32.totalorder (!%p2946_p0), %s2922_s12, 0 }
  0xbe   : > { %501 = sbr.rel (%p2946_p0) target bundleno = 1848 (0x738), region = 60  ;;  %s1635_s8 = sshll.u32 (!%p2946_p0), %s2668_s15, 2 }
  0xbf   : > { %s504_s13 = scalar_lea.sflag (!%p2946_p0), [#allocation6], %s2668_s15  ;;  %s2672_s11 = scalar_lea.vmem (!%p2946_p0), [#allocation5], %s1635_s8 }
  0xc5   : > { %2171 = dma.done.wait (%p2947_p12), %s504_s13, 64  }
  0xc6   : > { %2173 = vsyncadd (%p2947_p12), %s504_s13, 4294967232  ;;  %s512_s1 = sand.u32 1, %s2365_s24   ;;  %s516_s30 = scalar_lea.vmem [#allocation8], %s1635_s8 }
  0xc7   : > { %s513_s21 = scalar_lea.sflag [#allocation9], %s512_s1 }
  0xc8   : > { %2175 = dma.done.wait (%p2947_p12), %s513_s21, 64  }
  0xc9   : > { %2177 = vsyncadd (%p2947_p12), %s513_s21, 4294967232  ;;  %s2948_s5 = sld [smem:[#allocation31_spill]]  ;;  %s523_s22 = sand.u32 1, %s2196_s14  }
  0xca   : > { %s2684_s3 = sshll.u32 %s523_s22, 4 }
  0xcb   : > { %s525_s29 = scalar_lea.vmem [#allocation10], %s2684_s3 }
  0xcf   : > { %p2949_p13 = scmp.ne.s32.totalorder %s2948_s5, 0 }
  0xd1   : > { %2179 = dma.done.wait (%p2949_p13), %s513_s21, 256  }
  0xd2   : > { %2181 = vsyncadd (%p2949_p13), %s513_s21, 4294967040  ;;  %s531_s24 = scalar_lea.sflag [#allocation12], %s512_s1  ;;  %s534_s28 = scalar_lea.vmem [#allocation11], %s2684_s3 }
  0xd3   : > { %2183 = dma.done.wait (%p2949_p13), %s531_s24, 512  }
  0xd4   : > { %2185 = vsyncadd (%p2949_p13), %s531_s24, 4294966784  ;;  %v2241_v0 = vmov 0.0   ;;  %vm2242_vm0 = vmmov 0   ;;  %v1917_v1 = vld [vmem:[%s534_s28] sm:$0xff]   ;;  %v1918_v2 = vld [vmem:[%s534_s28 + $0x8] sm:$0xff]   ;;  %s2950_s12 = sld [smem:[#allocation23_spill]] }
  0xd5   : > { %1709 = vmatprep.subr.bf16.mxu0 %v2241_v0  ;;  %1717 = vmatprep.subr.bf16.mxu1 %v2241_v0  ;;  %v1919_v3 = vld [vmem:[%s525_s29] sm:$0xff]   ;;  %v1920_v4 = vld [vmem:[%s525_s29 + $0x8] sm:$0xff]   ;;  %vm659_vm1 = vcmask 261120   ;;  %s2951_s23 = sld [smem:[#allocation37_spill]]  ;;  %s2952_s27 = sld [smem:[#allocation35_spill]]  ;;  %vm704_vm2 = vcmask 519168  }
  0xd6   : > { %1713 = vmatprep.mubr.msk.bf16.mxu0 %vm2242_vm0, %v2241_v0  ;;  %1721 = vmatprep.mubr.msk.bf16.mxu1 %vm2242_vm0, %v2241_v0  ;;  %v635_v5 = vld [vmem:[%s516_s30] sm:$0xf]  ;;  %v706_v6 = vld [vmem:[%s2672_s11] sm:$0xf]  ;;  %vm775_vm3 = vcmask 257024   ;;  %vm779_vm4 = vcmask 64512  }
  0xd7   : > { %1710 = vmatpush3.bf16.msra.mxu0 %v1917_v1  ;;  %1718 = vmatpush3.bf16.msra.mxu1 %v1919_v3  ;;  %s2243_s9 = smov 112   ;;  %s2244_s7 = smov 120   ;;  %vm844_vm5 = vcmask 1043456   ;;  %vm891_vm6 = vcmask 60416   ;;  %vm1018_vm7 = vcmask 126016   ;;  %vm1145_vm8 = vcmask 191616  }
  0xd8   : > { %1711 = vmatprep.subr.bf16.mxu0 %v2241_v0  ;;  %1719 = vmatprep.subr.bf16.mxu1 %v2241_v0  ;;  %s2245_s8 = smov 104   ;;  %s2246_s13 = smov 96   ;;  %vm1272_vm9 = vcmask 257216  }
  0xd9   : > { %s2247_s1 = smov 80   ;;  %s2248_s21 = smov 72  }
  0xda   : > { %p615_p6 = scmp.lt.s32.totalorder %s2950_s12, 1  ;;  %s2249_s30 = smov 88  }
  0xdb   : > { %1712 = vmatpush3.bf16.msra.mxu0 %v1918_v2  ;;  %1720 = vmatpush3.bf16.msra.mxu1 %v1920_v4  ;;  %s2250_s5 = smov 8   ;;  %s543_s22 = scalar_lea.vmem [#allocation13], %s2684_s3 }
  0xdc   : > { %1725 = vmatprep.subr.bf16.mxu0 %v2241_v0  ;;  %1731 = vmatprep.subr.bf16.mxu1 %v2241_v0  ;;  %s2715_s16 = scalar_select %p615_p6, %s2950_s12, 1 }
  0xdd   : > { %s2251_s29 = smov 16   ;;  %s2252_s3 = smov 24  }
  0xde   : > { %1714 = vmatmul.mubr.msk.bf16.vlgmr.msra.gmra.mrb[0].mxu0 %vm659_vm1, %v635_v5  ;;  %1722 = vmatmul.mubr.msk.bf16.vlgmr.msra.gmra.mrb[0].mxu1 %vm659_vm1, %v706_v6  ;;  %s620_s19 = scalar_lea.vmem %s2951_s23, %s2715_s16  ;;  %s617_s10 = scalar_lea.vmem %s2952_s27, %s2715_s16 }
  0xdf   : > { %1727 = vmatprep.mubr.msk.bf16.mxu0 %vm2242_vm0, %v2241_v0  ;;  %1733 = vmatprep.mubr.msk.bf16.mxu1 %vm2242_vm0, %v2241_v0  ;;  %v1641_v7 = vld [vmem:[%s620_s19] ss:$0 sm:$0xff]  ;;  %s2953_s25 = sld [smem:[#allocation38_spill]]  ;;  %s2954_s23 = sld [smem:[#allocation22_spill]] }
  0xe0   : > { %v1645_v9 = vld [vmem:[%s617_s10] ss:$0 sm:$0xff]  ;;  %s1674_s19 = sshll.u32 %s2950_s12, 1  ;;  %s2955_s27 = sld [smem:[#allocation39_spill]] }
  0xe5   : > { %s623_s20 = scalar_lea.vmem %s2953_s25, %s2715_s16  ;;  %s2253_s25 = smov [#allocation14]  }
  0xe6   : > { %s626_s10 = scalar_lea.vmem %s2955_s27, %s2715_s16 }
 0x1b1   : > { %v697_v8 = vpop.f32.mrb[0].mxu0  ;;  %v768_v13 = vpop.f32.mrb[0].mxu1 }
 0x1b2   : > { %v698_v10 = vadd.f32 %v1641_v7, %v697_v8  ;;  %v1715_v11 = vpop.f32.mrb[1].mxu0  ;;  %v769_v16 = vadd.f32 %v1645_v9, %v768_v13  ;;  %v1723_v17 = vpop.f32.mrb[1].mxu1 }
 0x1b3   : > { %v700_v12 = vpop.f32.mrb[2].mxu0  ;;  %v771_v18 = vpop.f32.mrb[2].mxu1 }
 0x1b4   : > { %v703_v14 = vpack.c.bf16 %v698_v10, %v698_v10  ;;  %v1716_v15 = vpop.f32.mrb[3].mxu0  ;;  %v774_v19 = vpack.c.bf16 %v769_v16, %v769_v16  ;;  %v1724_v20 = vpop.f32.mrb[3].mxu1 }
 0x1b6   : > { %705 = vst.msk [vmem:[#allocation2] sm:$0xf] %vm704_vm2, %v703_v14 }
 0x1b7   : > { %776 = vst.msk [vmem:[#allocation3] sm:$0xf] %vm775_vm3, %v774_v19 }
 0x1bd   : > { %v778_v21 = vld [vmem:[#allocation2] sm:$0xf] }
 0x1be   : > { %v2725_v22 = vld [vmem:[#allocation2] ss:$0 sps:$4 sm:$0xff]   ;;  %v784_v23 = vsel %vm779_vm4, %v778_v21, 0  ;;  %v1923_v25 = vld [vmem:[#allocation3] ss:$0 sps:$4 sm:$0xff]   ;;  %v1650_v30 = vcombine.low %v778_v21, %v778_v21 }
 0x1bf   : > { %v2728_v24 = vld [vmem:[#allocation2] ss:$0 sps:$4 sm:$0xff]   ;;  %1726 = vmatpush3.bf16.xpose.msra.mxu0 %v784_v23  ;;  %1030 = vrot.lane.b32.xlu1 %v2725_v22, %s2243_s9  ;;  %v1924_v26 = vld [vmem:[#allocation3] ss:$0 sps:$4 sm:$0xff]  }
 0x1c0   : > { %903 = vrot.lane.b32.xlu0 %v2728_v24, %s2244_s7  ;;  %1737 = vmatprep.subr.bf16.mxu0 %v2241_v0  ;;  %v777_v27 = vld [vmem:[#allocation3] sm:$0xf]  ;;  %v1926_v29 = vld [vmem:[#allocation2] ss:$0 sps:$4 sm:$0xff]  }
 0x1c1   : > { %v1925_v28 = vld [vmem:[#allocation3] ss:$0 sps:$4 sm:$0xff]  }
 0x1c3   : > { %1025 = vrot.lane.b32.xlu1 %v1923_v25, %s2243_s9 }
 0x1c4   : > { %898 = vrot.lane.b32.xlu0 %v1924_v26, %s2244_s7 }
 0x1c6   : > { %1728 = vmatmul.mubr.msk.bf16.vlgmr.msra.gmra.mrb[4].mxu0 %vm779_vm4, %v777_v27 }
 0x1c7   : > { %1152 = vrot.lane.b32.xlu1 %v1925_v28, %s2245_s8  ;;  %1739 = vmatprep.mubr.msk.bf16.mxu0 %vm2242_vm0, %v2241_v0 }
 0x1c8   : > { %1157 = vrot.lane.b32.xlu0 %v1926_v29, %s2245_s8  ;;  %s2956_s8 = sld [smem:[#allocation40_spill]] }
 0x1cb   : > { %839 = vrot.lane.b32.xlu1 %v1650_v30, %s2246_s13 }
 0x1ce   : > { %s629_s13 = scalar_lea.vmem %s2956_s8, %s2715_s16  ;;  %s1376_s16 = scalar_lea.sflag [#allocation7], %s2668_s15 }
 0x231   : > { %v1031_v31 = vpop.permute.xlu1 %1030 }
 0x232   : > { %v904_v32 = vpop.permute.xlu0 %903  ;;  %v1036_v37 = vsel %vm779_vm4, %v1031_v31, 0 }
 0x233   : > { %v909_v33 = vsel %vm779_vm4, %v904_v32, 0 }
 0x234   : > { %1738 = vmatpush3.bf16.xpose.msra.mxu0 %v909_v33 }
 0x235   : > { %v1026_v34 = vpop.permute.xlu1 %1025  ;;  %1749 = vmatprep.subr.bf16.mxu0 %v2241_v0 }
 0x236   : > { %v899_v36 = vpop.permute.xlu0 %898 }
 0x239   : > { %v1153_v35 = vpop.permute.xlu1 %1152 }
 0x23a   : > { %v1158_v40 = vpop.permute.xlu0 %1157 }
 0x23b   : > { %1740 = vmatmul.mubr.msk.bf16.vlgmr.msra.gmra.mrb[8].mxu0 %vm779_vm4, %v899_v36  ;;  %v1163_v41 = vsel %vm779_vm4, %v1158_v40, 0 }
 0x23c   : > { %1750 = vmatpush3.bf16.xpose.msra.mxu0 %v1036_v37  ;;  %1751 = vmatprep.mubr.msk.bf16.mxu0 %vm2242_vm0, %v2241_v0 }
 0x23d   : > { %v840_v38 = vpop.permute.xlu1 %839  ;;  %1761 = vmatprep.subr.bf16.mxu0 %v2241_v0 }
 0x23e   : > { %v846_v39 = vsel %vm844_vm5, %v840_v38, 0 }
 0x23f   : > { %1732 = vmatpush3.bf16.msra.mxu1 %v846_v39 }
 0x240   : > { %1743 = vmatprep.subr.bf16.mxu1 %v2241_v0 }
 0x243   : > { %1752 = vmatmul.mubr.msk.bf16.vlgmr.msra.gmra.mrb[12].mxu0 %vm779_vm4, %v1026_v34 }
 0x244   : > { %1762 = vmatpush3.bf16.xpose.msra.mxu0 %v1163_v41  ;;  %1763 = vmatprep.mubr.msk.bf16.mxu0 %vm2242_vm0, %v2241_v0 }
 0x245   : > { %1773 = vmatprep.subr.bf16.mxu0 %v2241_v0 }
 0x24b   : > { %1764 = vmatmul.mubr.msk.bf16.vlgmr.msra.gmra.mrb[16].mxu0 %vm779_vm4, %v1153_v35 }
 0x24c   : > { %1777 = vmatprep.mubr.msk.bf16.mxu0 %vm2242_vm0, %v2241_v0 }
 0x299   : > { %v820_v42 = vpop.f32.mrb[4].mxu0 }
 0x29a   : > { %v1729_v43 = vpop.f32.mrb[5].mxu0  ;;  %v826_v44 = vsel %vm779_vm4, %v820_v42, -inf }
 0x29b   : > { %827 = vmax.xlane.f32.xlu0 %v826_v44  ;;  %v823_v45 = vpop.f32.mrb[6].mxu0 }
 0x29c   : > { %v1730_v46 = vpop.f32.mrb[7].mxu0 }
 0x30e   : > { %v945_v47 = vpop.f32.mrb[8].mxu0 }
 0x30f   : > { %v1741_v48 = vpop.f32.mrb[9].mxu0  ;;  %v951_v49 = vsel %vm779_vm4, %v945_v47, -inf }
 0x310   : > { %952 = vmax.xlane.f32.xlu1 %v951_v49  ;;  %v948_v50 = vpop.f32.mrb[10].mxu0 }
 0x311   : > { %v1742_v51 = vpop.f32.mrb[11].mxu0 }
 0x312   : > { %v1928_v51 = vld [vmem:[%s543_s22] sm:$0xff]  }
 0x313   : > { %1774 = vmatpush3.bf16.msra.mxu0 %v1928_v51 }
 0x314   : > { %1775 = vmatprep.subr.bf16.mxu0 %v2241_v0 }
 0x316   : > { %v1072_v52 = vpop.f32.mrb[12].mxu0 }
 0x317   : > { %v1753_v53 = vpop.f32.mrb[13].mxu0  ;;  %v1078_v54 = vsel %vm779_vm4, %v1072_v52, -inf }
 0x318   : > { %1079 = vmax.xlane.f32.xlu0 %v1078_v54  ;;  %v1075_v55 = vpop.f32.mrb[14].mxu0 }
 0x319   : > { %v1754_v56 = vpop.f32.mrb[15].mxu0  ;;  %v1929_v55 = vld [vmem:[%s543_s22 + $0x8] sm:$0xff]  }
 0x31a   : > { %1776 = vmatpush3.bf16.msra.mxu0 %v1929_v55 }
 0x31e   : > { %v1199_v57 = vpop.f32.mrb[16].mxu0 }
 0x31f   : > { %v1765_v58 = vpop.f32.mrb[17].mxu0  ;;  %v1205_v59 = vsel %vm779_vm4, %v1199_v57, -inf }
 0x320   : > { %1206 = vmax.xlane.f32.xlu0 %v1205_v59  ;;  %v1202_v60 = vpop.f32.mrb[18].mxu0 }
 0x321   : > { %1088 = vrot.lane.b32.xlu1 %v2725_v22, %s2247_s1  ;;  %v1766_v61 = vpop.f32.mrb[19].mxu0  ;;  %s1388_s1 = sadd.s32 %s2954_s23, %s1674_s19 }
 0x325   : > { %1215 = vrot.lane.b32.xlu1 %v1926_v29, %s2248_s21  ;;  %s2957_s21 = sld [smem:[#allocation32_spill]] }
 0x328   : > { %v828_v62 = vpop.xlane.xlu0 %827 }
 0x329   : > { %v829_v63 = vsub.f32 %v820_v42, %v828_v62 }
 0x32b   : > { %v830_v1 = vmul.f32 1.442695, %v829_v63  ;;  %p2959_p5 = scmp.ne.s32.totalorder %s2957_s21, 0 }
 0x32d   : > { %1930 = vpow2.f32 %v830_v1 }
 0x336   : > { %961 = vrot.lane.b32.xlu0 %v2728_v24, %s2249_s30  ;;  %s1675_s30 = sshll.u32 %s1388_s1, 7 }
 0x337   : > { %v1931_v2 = vpop.eup %1930 }
 0x338   : > { %v835_v3 = vpack.c.bf16 %v1931_v2, %v1931_v2  ;;  %v832_v27 = vsel %vm779_vm4, %v1931_v2, 0.0 }
 0x33a   : > { %1734 = vmatmul.mubr.msk.bf16.vlgmr.msra.gmra.mrb[4].mxu1 %vm779_vm4, %v835_v3  ;;  %v1341_v3 = vld [vmem:[%s2672_s11] sm:$0xf]  ;;  %s1640_s11 = sshll.u32 %s2668_s15, 3 }
 0x33b   : > { %1745 = vmatprep.mubr.msk.bf16.mxu1 %vm2242_vm0, %v2241_v0 }
 0x39d   : > { %v953_v4 = vpop.xlane.xlu1 %952 }
 0x39e   : > { %v954_v5 = vsub.f32 %v945_v47, %v953_v4  ;;  %v1667_v4 = vld [vmem:[%s623_s20] ss:$0 sm:$0xff]  ;;  %s2102_s20 = sshll.u32 %s2253_s25, 4  ;;  %s2103_s20 = int_to_ptr.vmem [resolvable:$false] %s2102_s20 }
 0x39f   : > { %s2104_s23 = scalar_lea.vmem %s2103_s20, 256 }
 0x3a0   : > { %v955_v6 = vmul.f32 1.442695, %v954_v5  ;;  %v1342_v5 = vunpack.c.l.bf16 %v1341_v3 }
 0x3a1   : > { %v1089_v17 = vpop.permute.xlu1 %1088 }
 0x3a2   : > { %1932 = vpow2.f32 %v955_v6  ;;  %v1094_v21 = vsel %vm844_vm5, %v1089_v17, 0 }
 0x3a5   : > { %v1080_v7 = vpop.xlane.xlu0 %1079  ;;  %v1216_v22 = vpop.permute.xlu1 %1215 }
 0x3a6   : > { %v1081_v8 = vsub.f32 %v1072_v52, %v1080_v7  ;;  %v1221_v26 = vsel %vm844_vm5, %v1216_v22, 0  ;;  %v1671_v22 = vld [vmem:[%s626_s10] ss:$0 sm:$0xff] }
 0x3a8   : > { %v1082_v9 = vmul.f32 1.442695, %v1081_v8 }
 0x3aa   : > { %1934 = vpow2.f32 %v1082_v9 }
 0x3ac   : > { %v1933_v10 = vpop.eup %1932 }
 0x3ad   : > { %v1207_v11 = vpop.xlane.xlu0 %1206  ;;  %v957_v12 = vsel %vm779_vm4, %v1933_v10, 0.0  ;;  %v960_v19 = vpack.c.bf16 %v1933_v10, %v1933_v10 }
 0x3ae   : > { %v1208_v13 = vsub.f32 %v1199_v57, %v1207_v11  ;;  %958 = vadd.xlane.f32.xlu0 %v957_v12 }
 0x3b0   : > { %v1209_v14 = vmul.f32 1.442695, %v1208_v13 }
 0x3b1   : > { %v962_v15 = vpop.permute.xlu0 %961 }
 0x3b2   : > { %1936 = vpow2.f32 %v1209_v14  ;;  %v967_v16 = vsel %vm844_vm5, %v962_v15, 0 }
 0x3b3   : > { %1744 = vmatpush3.bf16.msra.mxu1 %v967_v16 }
 0x3b4   : > { %v1935_v18 = vpop.eup %1934  ;;  %1755 = vmatprep.subr.bf16.mxu1 %v2241_v0 }
 0x3b5   : > { %v1084_v20 = vsel %vm779_vm4, %v1935_v18, 0.0  ;;  %v1087_v24 = vpack.c.bf16 %v1935_v18, %v1935_v18 }
 0x3b6   : > { %1085 = vadd.xlane.f32.xlu1 %v1084_v20  ;;  %1746 = vmatmul.mubr.msk.bf16.vlgmr.msra.gmra.mrb[8].mxu1 %vm779_vm4, %v960_v19 }
 0x3b7   : > { %1756 = vmatpush3.bf16.msra.mxu1 %v1094_v21  ;;  %1757 = vmatprep.mubr.msk.bf16.mxu1 %vm2242_vm0, %v2241_v0 }
 0x3b8   : > { %1767 = vmatprep.subr.bf16.mxu1 %v2241_v0 }
 0x3bc   : > { %v1937_v23 = vpop.eup %1936 }
 0x3bd   : > { %v1211_v25 = vsel %vm779_vm4, %v1937_v23, 0.0  ;;  %v1214_v28 = vpack.c.bf16 %v1937_v23, %v1937_v23 }
 0x3be   : > { %1212 = vadd.xlane.f32.xlu0 %v1211_v25  ;;  %1758 = vmatmul.mubr.msk.bf16.vlgmr.msra.gmra.mrb[12].mxu1 %vm779_vm4, %v1087_v24  ;;  %v1672_v24 = vld [vmem:[%s629_s13] ss:$0 sm:$0xff] }
 0x3bf   : > { %1768 = vmatpush3.bf16.msra.mxu1 %v1221_v26  ;;  %1769 = vmatprep.mubr.msk.bf16.mxu1 %vm2242_vm0, %v2241_v0 }
 0x3c2   : > { %833 = vadd.xlane.f32.xlu0 %v832_v27 }
 0x3c6   : > { %1770 = vmatmul.mubr.msk.bf16.vlgmr.msra.gmra.mrb[16].mxu1 %vm779_vm4, %v1214_v28 }
 0x40d   : > { %v882_v29 = vpop.f32.mrb[4].mxu1 }
 0x40e   : > { %v1735_v30 = vpop.f32.mrb[5].mxu1 }
 0x40f   : > { %v885_v31 = vpop.f32.mrb[6].mxu1 }
 0x410   : > { %v1736_v32 = vpop.f32.mrb[7].mxu1 }
 0x43b   : > { %v959_v33 = vpop.xlane.xlu0 %958 }
 0x443   : > { %v1086_v39 = vpop.xlane.xlu1 %1085 }
 0x44b   : > { %v1213_v34 = vpop.xlane.xlu0 %1212 }
 0x44f   : > { %v834_v35 = vpop.xlane.xlu0 %833 }
 0x450   : > { %1938 = vrcp.f32 %v834_v35 }
 0x451   : > { %1940 = vrcp.f32 %v959_v33 }
 0x452   : > { %1942 = vrcp.f32 %v1086_v39 }
 0x453   : > { %1944 = vrcp.f32 %v1213_v34 }
 0x45a   : > { %v1939_v36 = vpop.eup %1938 }
 0x45b   : > { %v889_v37 = vmul.f32 %v1939_v36, %v882_v29  ;;  %v1941_v40 = vpop.eup %1940 }
 0x45c   : > { %v1943_v47 = vpop.eup %1942 }
 0x45d   : > { %v890_v38 = vpack.c.bf16 %v889_v37, %v889_v37  ;;  %v1945_v56 = vpop.eup %1944 }
 0x45f   : > { %892 = vst.msk [vmem:[#allocation4] sm:$0xf] %vm891_vm6, %v890_v38 }
 0x489   : > { %v1003_v41 = vpop.f32.mrb[8].mxu1 }
 0x48a   : > { %v1010_v42 = vmul.f32 %v1941_v40, %v1003_v41  ;;  %v1747_v43 = vpop.f32.mrb[9].mxu1 }
 0x48b   : > { %v1006_v44 = vpop.f32.mrb[10].mxu1 }
 0x48c   : > { %v1681_v45 = vpack.c.bf16 %v1010_v42, %v1010_v42  ;;  %v1748_v46 = vpop.f32.mrb[11].mxu1 }
 0x48e   : > { %1015 = vrot.lane.b32.xlu1 %v1681_v45, %s2250_s5  ;;  %s614_s5 = scalar_lea.vmem [#allocation14], %s1640_s11 }
 0x48f   : > { %s1392_s22 = sshll.u32 %s614_s5, 4  ;;  %s2804_s22 = int_to_ptr.vmem [resolvable:$true] %s1392_s22 }
 0x490   : > { %s2098_s28 = scalar_lea.vmem %s2804_s22, 128  ;;  %p2105_p4 = scmp.lt.s32.totalorder %s2804_s22, %s2103_s20 }
 0x491   : > { %v1130_v48 = vpop.f32.mrb[12].mxu1  ;;  %p2099_p2 = scmp.ne.s32.totalorder %s2804_s22, %s2098_s28  ;;  %p2106_p9 = scmp.lt.s32.totalorder %s2104_s23, %s2098_s28 }
 0x492   : > { %v1137_v49 = vmul.f32 %v1943_v47, %v1130_v48  ;;  %v1759_v50 = vpop.f32.mrb[13].mxu1 }
 0x493   : > { %v1133_v52 = vpop.f32.mrb[14].mxu1  ;;  %p2100_p10 = pnand %p2099_p2, %p2959_p5  ;;  %p2107_p8 = por %p2106_p9, %p2105_p4 }
 0x494   : > { %v1682_v53 = vpack.c.bf16 %v1137_v49, %v1137_v49  ;;  %v1760_v54 = vpop.f32.mrb[15].mxu1 }
 0x495   : > { %p2101_p3 = pneg %p2100_p10 }
 0x496   : > { %1142 = vrot.lane.b32.xlu0 %v1682_v53, %s2251_s29 }
 0x497   : > { %p2108_p11 = pnand %p2107_p8, %p2101_p3 }
 0x499   : > { %v1257_v57 = vpop.f32.mrb[16].mxu1 }
 0x49a   : > { %v1264_v58 = vmul.f32 %v1945_v56, %v1257_v57  ;;  %v1771_v59 = vpop.f32.mrb[17].mxu1 }
 0x49b   : > { %v1260_v60 = vpop.f32.mrb[18].mxu1 }
 0x49c   : > { %v1683_v61 = vpack.c.bf16 %v1264_v58, %v1264_v58  ;;  %v1772_v62 = vpop.f32.mrb[19].mxu1 }
 0x49e   : > { %1269 = vrot.lane.b32.xlu1 %v1683_v61, %s2252_s3  ;;  %s2958_s3 = sld [smem:[#allocation41_spill]] }
 0x4a4   : > { %s2802_s24 = scalar_lea.hbm %s2958_s3, %s1675_s30 }
 0x500   : > { %v1016_v63 = vpop.permute.xlu1 %1015 }
 0x501   : > { %1019 = vst.msk [vmem:[#allocation4] sm:$0xf] %vm1018_vm7, %v1016_v63 }
 0x508   : > { %v1143_v1 = vpop.permute.xlu0 %1142 }
 0x509   : > { %1146 = vst.msk [vmem:[#allocation4] sm:$0xf] %vm1145_vm8, %v1143_v1 }
 0x510   : > { %v1270_v0 = vpop.permute.xlu1 %1269 }
 0x511   : > { %1273 = vst.msk [vmem:[#allocation4] sm:$0xf] %vm1272_vm9, %v1270_v0 }
 0x518   : > { %v1274_v2 = vld [vmem:[#allocation4] sm:$0xf] }
 0x519   : > { %1778 = vmatmul.mubr.msk.bf16.vlgmr.msra.gmra.mrb[20].mxu0 %vm659_vm1, %v1274_v2 }
 0x5ec   : > { %v1335_v6 = vpop.f32.mrb[20].mxu0 }
 0x5ed   : > { %v1336_v7 = vadd.f32 %v1667_v4, %v1335_v6  ;;  %v1779_v8 = vpop.f32.mrb[21].mxu0 }
 0x5ee   : > { %v1338_v9 = vpop.f32.mrb[22].mxu0 }
 0x5ef   : > { %v1780_v10 = vpop.f32.mrb[23].mxu0  ;;  %v1343_v11 = vadd.f32 %v1342_v5, %v1336_v7 }
 0x5f1   : > { %v1344_v12 = vsel %vm659_vm1, %v1343_v11, 0.0 }
 0x5f2   : > { %1345 = vadd.xlane.f32.xlu1 %v1344_v12 }
 0x67f   : > { %v1346_v13 = vpop.xlane.xlu1 %1345 }
 0x680   : > { %v1348_v14 = vmul.f32 0.03125, %v1346_v13 }
 0x682   : > { %v1349_v15 = vsub.f32 %v1343_v11, %v1348_v14 }
 0x684   : > { %v1350_v16 = vmul.f32 %v1349_v15, %v1349_v15 }
 0x686   : > { %v1351_v17 = vsel %vm659_vm1, %v1350_v16, 0.0 }
 0x687   : > { %1352 = vadd.xlane.f32.xlu0 %v1351_v17 }
 0x714   : > { %v1353_v18 = vpop.xlane.xlu0 %1352 }
 0x715   : > { %v1354_v19 = vmul.f32 0.03125, %v1353_v18 }
 0x717   : > { %v1355_v20 = vadd.f32 1e-12, %v1354_v19 }
 0x719   : > { %1946 = vrsqrt.f32 %v1355_v20 }
 0x723   : > { %v1947_v21 = vpop.eup %1946 }
 0x724   : > { %v1357_v23 = vmul.f32 %v1947_v21, %v1349_v15 }
 0x726   : > { %v1365_v25 = vmul.f32 %v1671_v22, %v1357_v23 }
 0x728   : > { %v1373_v26 = vadd.f32 %v1672_v24, %v1365_v25 }
 0x72a   : > { %1374 = vst.msk [vmem:[%s614_s5] sm:$0xff] %vm659_vm1, %v1373_v26 }
 0x72b   : > { %2111 = shalt.err (!%p2108_p11)
}
 0x72c   : > { %s2112_s15 = scalar_lea.hbm %s2802_s24, 128  ;;  %s2116_s26 = scalar_lea.hbm %s2958_s3, 512 }
 0x72d   : > { %p2113_p1 = scmp.ne.s32.totalorder %s2802_s24, %s2112_s15  ;;  %p2117_p12 = scmp.lt.u32.totalorder %s2802_s24, %s2958_s3 }
 0x72e   : > { %p2118_p13 = scmp.lt.u32.totalorder %s2116_s26, %s2112_s15  ;;  %p2120_p2 = scmp.lt.u32.totalorder %s2112_s15, %s2802_s24 }
 0x72f   : > { %p2114_p7 = pnand %p2113_p1, %p2959_p5 }
 0x730   : > { %p2119_p6 = por %p2118_p13, %p2117_p12 }
 0x731   : > { %p2115_p0 = pneg %p2114_p7 }
 0x732   : > { %p2121_p10 = por %p2120_p2, %p2119_p6 }
 0x734   : > { %p2122_p3 = pnand %p2121_p10, %p2115_p0 }
 0x736   : > { %2125 = shalt.err (!%p2122_p3)
}
 0x737   : > { %1791 = dma.vmem_to_hbm [thread:$0]  (%p2959_p5), %s2804_s22, 128, %s2802_s24, %s1376_s16  }
 0x738 PF: > { %s2960_s10 = sld [smem:[#allocation26_spill]]  ;;  %s2961_s9 = sld [smem:[#allocation21_spill]] }
 0x739   : > { %s2962_s7 = sld [smem:[#allocation33_spill]] }
 0x73e   : > { %p1814_p4 = scmp.ge.s32.totalorder %s2960_s10, 2  ;;  %s1404_s8 = sand.u32 1, %s2961_s9  }
 0x73f   : > { %p2963_p9 = scmp.ne.s32.totalorder %s2962_s7, 0  ;;  %s1405_s13 = scalar_lea.sflag [#allocation7], %s1404_s8 }
 0x741   : > { %p1810_p8 = pnand %p1814_p4, %p2963_p9 }
 0x743   : > { %2187 = dma.done.wait (!%p1810_p8), %s1405_s13, 128  }
 0x744   : > { %2189 = vsyncadd (!%p1810_p8), %s1405_s13, 4294967168  ;;  %s32_s23 = sadd.s32 1, %s2960_s10   ;;  %s2964_s1 = sld [smem:[#allocation20_spill]] }
 0x745   : > { %p29_p11 = scmp.ge.s32.totalorder %s32_s23, 6   ;;  %s2965_s15 = sld [smem:[#allocation29_spill]] }
 0x746   : > { %s2966_s21 = sld [smem:[#allocation30_spill]]  ;;  %s2967_s19 = sld [smem:[#allocation24_spill]] }
 0x747   : > { %s2968_s20 = sld [smem:[#allocation25_spill]]  ;;  %s2969_s30 = sld [smem:[#allocation27_spill]] }
 0x748   : > { %s2970_s22 = sld [smem:[#allocation28_spill]]  ;;  %s2971_s13 = smov %s2196_s14 }
 0x749   : > { %s2973_s16 = smov %s2208_s17  ;;  %s2974_s17 = smov %s2212_s18 }
 0x74a   : > { %s2972_s14 = smov %s2964_s1  ;;  %31 = sbr.rel (!%p29_p11) target bundleno = 22 (0x16), region = 172 }
 0x74c   : > { %s2975_s18 = smov %s2966_s21 }
 0x74d   : > { %s2976_s21 = smov %s2969_s30 }
 0x751   :  { %1410 = vsyncpa [#allocation6], 1 }
 0x752   :  { %1412 = vsyncpa [#allocation6 + $0x1], 1 }
 0x753   :  { %1413 = vsyncpa [#allocation9], 1 }
 0x754   :  { %1415 = vsyncpa [#allocation9 + $0x1], 1 }
 0x755   :  { %1416 = vsyncpa [#allocation12], 1 }
 0x756   :  { %1418 = vsyncpa [#allocation12 + $0x1], 1 }
 0x757   :  { %1419 = vsyncpa [#allocation7], 1 }
 0x758   :  { %1421 = vsyncpa [#allocation7 + $0x1], 1 }

</bundles_post_ra>
